<compile_context>
chip_gen: v5e
topology: v5e:2x2
jax: 0.10.0
libtpu: 0.0.40
codegen_flags: <defaults>
</compile_context>

<pallas_src>
import functools

import jax
import jax.numpy as jnp
from jax.experimental import pallas as pl
from jax.experimental.pallas import tpu as pltpu

_LANES = 128
_SUBLANES = 8
# Keep the resident-weight design viable on v7x (64 MiB VMEM per TensorCore):
# leave headroom for compiler scratch / spill space.
_VMEM_BUDGET_BYTES = 56 * 1024 * 1024

_SINGLE_BUFFER_SUPPORTED = None


def _round_up(x, m):
    return (x + m - 1) // m * m


def _single_buffer_supported():
    """Probe (once, eagerly) whether pl.Buffered(1) on an invariant input block
    compiles, runs and gives correct results on this JAX/TPU install."""
    global _SINGLE_BUFFER_SUPPORTED
    if _SINGLE_BUFFER_SUPPORTED is not None:
        return _SINGLE_BUFFER_SUPPORTED
    try:
        def _probe_kernel(c_ref, x_ref, o_ref):
            o_ref[...] = x_ref[...] + c_ref[...]

        probe = pl.pallas_call(
            _probe_kernel,
            out_shape=jax.ShapeDtypeStruct((16, _LANES), jnp.float32),
            grid_spec=pltpu.PrefetchScalarGridSpec(
                num_scalar_prefetch=0,
                grid=(2,),
                in_specs=[
                    pl.BlockSpec((_SUBLANES, _LANES), lambda i: (0, 0),
                                 pipeline_mode=pl.Buffered(1)),
                    pl.BlockSpec((_SUBLANES, _LANES), lambda i: (i, 0)),
                ],
                out_specs=pl.BlockSpec((_SUBLANES, _LANES), lambda i: (i, 0)),
            ),
        )
        c = jnp.full((_SUBLANES, _LANES), 2.0, jnp.float32)
        x = jnp.arange(16 * _LANES, dtype=jnp.float32).reshape(16, _LANES)
        out = jax.block_until_ready(probe(c, x))
        _SINGLE_BUFFER_SUPPORTED = bool(jnp.allclose(out, x + 2.0))
    except Exception:  # fall back to default double-buffering of the weights
        _SINGLE_BUFFER_SUPPORTED = False
    return _SINGLE_BUFFER_SUPPORTED


def _fused_mlp_kernel(x_ref, w_ref, b_ref, o_ref, *, num_layers, dim_in,
                      mxu_dtype):
    """Fused multi-layer perceptron on one row tile.

    x_ref: (TM, dim_in)  f32/bf16 activations (per row tile)
    w_ref: (L, P, P)     bf16, pre-transposed (in, out) layout, zero-padded
    b_ref: (L, 1, P)     f32, zero-padded
    o_ref: (TM, P)       bf16, lane-dense padded output (sliced in wrapper)
    """
    p = w_ref.shape[1]
    h = x_ref[...].astype(mxu_dtype)          # bf16 activations feed the MXU
    k = dim_in
    if k != p and k % 16 != 0:
        # Pad the layer-0 activations once so the static weight slice stays
        # sublane-packing aligned (avoids a per-tile weight repack copy).
        k = min(p, _round_up(k, 16))
        h = jnp.pad(h, ((0, 0), (0, k - dim_in)))
    for l in range(num_layers):               # static unroll: num_layers small
        w = w_ref[l] if k == p else w_ref[l][:k, :]
        # bf16 operands into the MXU, f32 accumulation; bias add stays f32.
        y = jnp.dot(h, w, preferred_element_type=jnp.float32) + b_ref[l]
        if l != num_layers - 1:
            # ReLU in f32 (v5e VPU has no bf16 path), then carry activations in
            # bf16 to halve the live/spill footprint between layers.
            h = jnp.maximum(y, 0.0).astype(mxu_dtype)
            k = p
        else:
            o_ref[...] = y.astype(o_ref.dtype)    # lane-dense bf16 store


def fused_mlp(x, w_stack, b_stack, *, layer_dims, tile_m=None,
              out_dtype=jnp.bfloat16, single_buffer_weights=True):
    """Run the whole MLP in one pallas_call. Returns the PADDED (N, P) output.

    x:        (N, dim_in)  activations (f32 or bf16)
    w_stack:  (L, P, P)    bf16, w_stack[l, :fan_in, :fan_out] = W_l.T
    b_stack:  (L, 1, P)    f32
    layer_dims: tuple of (fan_in, fan_out) per layer (real, unpadded)
    """
    n, dim_in = x.shape
    num_layers, p, _ = w_stack.shape

    x_itemsize = jnp.dtype(x.dtype).itemsize
    out_itemsize = jnp.dtype(out_dtype).itemsize
    mxu_itemsize = jnp.dtype(w_stack.dtype).itemsize
    w_bytes = w_stack.size * mxu_itemsize
    b_bytes = b_stack.size * jnp.dtype(b_stack.dtype).itemsize

    use_single_buffer = single_buffer_weights and _single_buffer_supported()
    w_bufs = 1 if use_single_buffer else 2

    # --- row tile selection -------------------------------------------------
    # Large tiles amortize the ~0.35 us fixed per-grid-step overhead; clamp so
    # grid_m >= 2 (keeps both v7x TensorCores busy via the "parallel" axis).
    if tile_m is None:
        tile_m = 2048
    tile_m = max(_SUBLANES, min(_round_up(tile_m, _SUBLANES),
                                _round_up(pl.cdiv(n, 2), _SUBLANES)))

    def vmem_need(tm):
        act = tm * p * (4 + mxu_itemsize)            # live f32 y + bf16 h
        return (w_bufs * (w_bytes + b_bytes)          # resident weight stack
                + 2 * tm * dim_in * x_itemsize        # double-buffered input
                + 2 * tm * p * out_itemsize           # double-buffered output
                + 2 * act)                            # 2x margin for temporaries

    while vmem_need(tile_m) > _VMEM_BUDGET_BYTES and tile_m > 64:
        tile_m = _round_up(tile_m // 2, _SUBLANES)
    if vmem_need(tile_m) > _VMEM_BUDGET_BYTES:
        # TODO(synk): stream weights per layer (extra "arbitrary" grid axis over
        # L or pltpu.emit_pipeline) when the (L,P,P) stack cannot stay resident
        # in v7x's 64 MiB VMEM; optionally store the stack in fp8 on v7x.
        raise ValueError(
            f"weight stack ({w_bytes / 2**20:.1f} MiB) too large to keep "
            "resident in VMEM; per-layer weight streaming not implemented")

    grid_m = pl.cdiv(n, tile_m)
    vmem_limit = int(min(60 << 20, max(32 << 20, vmem_need(tile_m) + (16 << 20))))

    kernel = functools.partial(
        _fused_mlp_kernel, num_layers=num_layers, dim_in=dim_in,
        mxu_dtype=w_stack.dtype)

    flops = 2 * n * sum(fi * fo for fi, fo in layer_dims)
    bytes_accessed = (n * dim_in * x_itemsize + w_bytes + b_bytes
                      + n * p * out_itemsize)

    resident_kw = dict(pipeline_mode=pl.Buffered(1)) if use_single_buffer else {}
    w_spec = pl.BlockSpec((num_layers, p, p), lambda i: (0, 0, 0), **resident_kw)
    b_spec = pl.BlockSpec((num_layers, 1, p), lambda i: (0, 0, 0), **resident_kw)

    return pl.pallas_call(
        kernel,
        out_shape=jax.ShapeDtypeStruct((n, p), out_dtype),
        grid_spec=pltpu.PrefetchScalarGridSpec(
            num_scalar_prefetch=0,
            grid=(grid_m,),
            in_specs=[
                # Row tile of activations; last dim equals full array dim.
                pl.BlockSpec((tile_m, dim_in), lambda i: (i, 0)),
                # Whole weight/bias stacks, constant index_map -> VMEM-resident.
                w_spec,
                b_spec,
            ],
            # Lane-dense (multiple-of-128) bf16 output store.
            out_specs=pl.BlockSpec((tile_m, p), lambda i: (i, 0)),
        ),
        compiler_params=pltpu.CompilerParams(
            dimension_semantics=("parallel",),
            vmem_limit_bytes=vmem_limit,
        ),
        cost_estimate=pl.CostEstimate(
            flops=flops, transcendentals=0, bytes_accessed=bytes_accessed),
    )(x, w_stack, b_stack)


def _mlp_forward(x, w_stack, b_stack, *, layer_dims, dim_out, tile_m):
    y_pad = fused_mlp(x, w_stack, b_stack, layer_dims=layer_dims, tile_m=tile_m)
    # Slice back to the real width + upcast to f32 inside the SAME jit program
    # as the pallas_call, so the epilogue is one small fused pass over bf16.
    return y_pad[:, :dim_out].astype(jnp.float32)


class MLP:
    """JAX/Pallas port of the PyTorch MLP module (forward pass)."""

    def __init__(self, dim_in, dim_out, dim_hidden, num_layers, bias=True,
                 key=None, mxu_dtype=jnp.bfloat16, tile_m=None):
        self.dim_in = dim_in
        self.dim_out = dim_out
        self.dim_hidden = dim_hidden
        self.num_layers = num_layers
        self.bias = bias

        if key is None:
            key = jax.random.PRNGKey(0)

        # Raw parameters in PyTorch convention (out_features, in_features).
        self.weights = []
        self.biases = []
        self.layer_dims = []
        for l in range(num_layers):
            fan_in = dim_in if l == 0 else dim_hidden
            fan_out = dim_out if l == num_layers - 1 else dim_hidden
            key, wk, bk = jax.random.split(key, 3)
            bound = float(fan_in) ** -0.5  # kaiming-uniform-style bound (PyTorch)
            w = jax.random.uniform(wk, (fan_out, fan_in), jnp.float32, -bound, bound)
            if bias:
                b = jax.random.uniform(bk, (fan_out,), jnp.float32, -bound, bound)
            else:
                b = jnp.zeros((fan_out,), jnp.float32)
            self.weights.append(w)
            self.biases.append(b)
            self.layer_dims.append((fan_in, fan_out))

        # Pack once for the fused kernel: transpose to (in, out), zero-pad all
        # feature dims to a common multiple of 128, stack over layers, bf16.
        p = _round_up(max(dim_in, dim_hidden, dim_out), _LANES)
        self.padded_dim = p
        w_stack = jnp.zeros((num_layers, p, p), mxu_dtype)
        b_stack = jnp.zeros((num_layers, 1, p), jnp.float32)
        for l, (fan_in, fan_out) in enumerate(self.layer_dims):
            w_stack = w_stack.at[l, :fan_in, :fan_out].set(
                self.weights[l].T.astype(mxu_dtype))
            b_stack = b_stack.at[l, 0, :fan_out].set(self.biases[l])
        self.w_stack = w_stack
        self.b_stack = b_stack

        self._forward = jax.jit(functools.partial(
            _mlp_forward,
            layer_dims=tuple(self.layer_dims),
            dim_out=dim_out,
            tile_m=tile_m))

    def __call__(self, x):
        return self._forward(x, self.w_stack, self.b_stack)


def mlp_reference(x, weights, biases, num_layers, mxu_dtype=jnp.bfloat16):
    """Plain-JAX reference mirroring the kernel's bf16-operand / f32-accum math."""
    h = x.astype(jnp.float32)
    for l in range(num_layers):
        w = weights[l].astype(mxu_dtype)
        h = jnp.dot(h.astype(mxu_dtype), w.T,
                    preferred_element_type=jnp.float32) + biases[l]
        if l != num_layers - 1:
            h = jnp.maximum(h, 0.0)
    return h


if __name__ == "__main__":
    key = jax.random.PRNGKey(0)
    key, xk = jax.random.split(key)

    # Small shapes consistent with the module (NeRF-style head MLP); batch is
    # deliberately NOT a multiple of the row tile to exercise the ragged tail.
    batch = 1000
    dim_in, dim_hidden, dim_out, num_layers = 32, 64, 16, 3

    x = jax.random.normal(xk, (batch, dim_in), jnp.float32)

    mlp = MLP(dim_in, dim_out, dim_hidden, num_layers, bias=True, key=key)

    out = jax.block_until_ready(mlp(x))

    ref = mlp_reference(x, mlp.weights, mlp.biases, num_layers)
    assert out.shape == (batch, dim_out)
    assert out.dtype == jnp.float32
    assert jnp.allclose(out, ref, atol=1e-2, rtol=1e-2), "mismatch vs reference"

    print("KERNEL_OK")
</pallas_src>

<mosaic_0001>
module attributes {stable_mosaic.version = 11 : i64} {
  func.func @_fused_mlp_kernel(%arg0: i32, %arg1: memref<504x32xf32, #tpu.memory_space<vmem>>, %arg2: memref<3x128x128xbf16, #tpu.memory_space<vmem>>, %arg3: memref<3x1x128xf32, #tpu.memory_space<vmem>>, %arg4: memref<504x128xbf16, #tpu.memory_space<vmem>>) attributes {dimension_semantics = [#tpu.dimension_semantics<parallel>], iteration_bounds = array<i64: 2>, scalar_prefetch = 0 : i64, scratch_operands = 0 : i64, tpu.core_type = #tpu.core_type<tc>, window_params = [{transform_indices = @transform_0, window_bounds = array<i64: 504, 32>}, {pipeline_mode = #tpu.pipeline_mode<synchronous>, transform_indices = @transform_1, window_bounds = array<i64: 3, 128, 128>}, {pipeline_mode = #tpu.pipeline_mode<synchronous>, transform_indices = @transform_2, window_bounds = array<i64: 3, 1, 128>}, {transform_indices = @transform_3, window_bounds = array<i64: 504, 128>}]} {
    %c0 = arith.constant 0 : index
    %c0_0 = arith.constant 0 : index
    %0 = vector.load %arg1[%c0, %c0_0] : memref<504x32xf32, #tpu.memory_space<vmem>>, vector<504x32xf32>
    %1 = arith.truncf %0 : vector<504x32xf32> to vector<504x32xbf16>
    %c0_1 = arith.constant 0 : index
    %c0_2 = arith.constant 0 : index
    %c0_3 = arith.constant 0 : index
    %2 = vector.load %arg2[%c0_1, %c0_2, %c0_3] : memref<3x128x128xbf16, #tpu.memory_space<vmem>>, vector<1x128x128xbf16>
    %3 = vector.shape_cast %2 : vector<1x128x128xbf16> to vector<128x128xbf16>
    %4 = vector.extract_strided_slice %3 {offsets = [0, 0], sizes = [32, 128], strides = [1, 1]} : vector<128x128xbf16> to vector<32x128xbf16>
    %cst = arith.constant dense<0.000000e+00> : vector<504x128xf32>
    %5 = tpu.matmul %1, %4, %cst {dimension_numbers = #tpu.dot_dimension_numbers<[1], [0], [0], [1], [0, 0, 1, 1], [], []>} : vector<504x32xbf16>, vector<32x128xbf16>, vector<504x128xf32> -> vector<504x128xf32>
    %c0_4 = arith.constant 0 : index
    %c0_5 = arith.constant 0 : index
    %c0_6 = arith.constant 0 : index
    %6 = vector.load %arg3[%c0_4, %c0_5, %c0_6] : memref<3x1x128xf32, #tpu.memory_space<vmem>>, vector<1x1x128xf32>
    %7 = vector.shape_cast %6 : vector<1x1x128xf32> to vector<1x128xf32>
    %8 = vector.broadcast %7 : vector<1x128xf32> to vector<504x128xf32>
    %9 = arith.addf %5, %8 : vector<504x128xf32>
    %cst_7 = arith.constant 0.000000e+00 : f32
    %10 = vector.broadcast %cst_7 : f32 to vector<504x128xf32>
    %11 = arith.maximumf %9, %10 : vector<504x128xf32>
    %12 = arith.truncf %11 : vector<504x128xf32> to vector<504x128xbf16>
    %c1 = arith.constant 1 : index
    %c0_8 = arith.constant 0 : index
    %c0_9 = arith.constant 0 : index
    %13 = vector.load %arg2[%c1, %c0_8, %c0_9] : memref<3x128x128xbf16, #tpu.memory_space<vmem>>, vector<1x128x128xbf16>
    %14 = vector.shape_cast %13 : vector<1x128x128xbf16> to vector<128x128xbf16>
    %cst_10 = arith.constant dense<0.000000e+00> : vector<504x128xf32>
    %15 = tpu.matmul %12, %14, %cst_10 {dimension_numbers = #tpu.dot_dimension_numbers<[1], [0], [0], [1], [0, 0, 1, 1], [], []>} : vector<504x128xbf16>, vector<128x128xbf16>, vector<504x128xf32> -> vector<504x128xf32>
    %c1_11 = arith.constant 1 : index
    %c0_12 = arith.constant 0 : index
    %c0_13 = arith.constant 0 : index
    %16 = vector.load %arg3[%c1_11, %c0_12, %c0_13] : memref<3x1x128xf32, #tpu.memory_space<vmem>>, vector<1x1x128xf32>
    %17 = vector.shape_cast %16 : vector<1x1x128xf32> to vector<1x128xf32>
    %18 = vector.broadcast %17 : vector<1x128xf32> to vector<504x128xf32>
    %19 = arith.addf %15, %18 : vector<504x128xf32>
    %cst_14 = arith.constant 0.000000e+00 : f32
    %20 = vector.broadcast %cst_14 : f32 to vector<504x128xf32>
    %21 = arith.maximumf %19, %20 : vector<504x128xf32>
    %22 = arith.truncf %21 : vector<504x128xf32> to vector<504x128xbf16>
    %c2 = arith.constant 2 : index
    %c0_15 = arith.constant 0 : index
    %c0_16 = arith.constant 0 : index
    %23 = vector.load %arg2[%c2, %c0_15, %c0_16] : memref<3x128x128xbf16, #tpu.memory_space<vmem>>, vector<1x128x128xbf16>
    %24 = vector.shape_cast %23 : vector<1x128x128xbf16> to vector<128x128xbf16>
    %cst_17 = arith.constant dense<0.000000e+00> : vector<504x128xf32>
    %25 = tpu.matmul %22, %24, %cst_17 {dimension_numbers = #tpu.dot_dimension_numbers<[1], [0], [0], [1], [0, 0, 1, 1], [], []>} : vector<504x128xbf16>, vector<128x128xbf16>, vector<504x128xf32> -> vector<504x128xf32>
    %c2_18 = arith.constant 2 : index
    %c0_19 = arith.constant 0 : index
    %c0_20 = arith.constant 0 : index
    %26 = vector.load %arg3[%c2_18, %c0_19, %c0_20] : memref<3x1x128xf32, #tpu.memory_space<vmem>>, vector<1x1x128xf32>
    %27 = vector.shape_cast %26 : vector<1x1x128xf32> to vector<1x128xf32>
    %28 = vector.broadcast %27 : vector<1x128xf32> to vector<504x128xf32>
    %29 = arith.addf %25, %28 : vector<504x128xf32>
    %30 = arith.truncf %29 : vector<504x128xf32> to vector<504x128xbf16>
    %c0_21 = arith.constant 0 : index
    %c0_22 = arith.constant 0 : index
    %31 = vector.load %arg4[%c0_21, %c0_22] : memref<504x128xbf16, #tpu.memory_space<vmem>>, vector<504x128xbf16>
    tpu.vector_store %arg4[%c0_21, %c0_22], %30 {strides = array<i32>} : memref<504x128xbf16, #tpu.memory_space<vmem>>, vector<504x128xbf16>,
    return
  }
  func.func @transform_0(%arg0: i32) -> (i32, i32) {
    %c0_i32 = arith.constant 0 : i32
    %c0_i32_0 = arith.constant 0 : i32
    return %arg0, %c0_i32 : i32, i32
  }
  func.func @transform_1(%arg0: i32) -> (i32, i32, i32) {
    %c0_i32 = arith.constant 0 : i32
    %c0_i32_0 = arith.constant 0 : i32
    %c0_i32_1 = arith.constant 0 : i32
    %c0_i32_2 = arith.constant 0 : i32
    return %c0_i32, %c0_i32_0, %c0_i32_1 : i32, i32, i32
  }
  func.func @transform_2(%arg0: i32) -> (i32, i32, i32) {
    %c0_i32 = arith.constant 0 : i32
    %c0_i32_0 = arith.constant 0 : i32
    %c0_i32_1 = arith.constant 0 : i32
    %c0_i32_2 = arith.constant 0 : i32
    return %c0_i32, %c0_i32_0, %c0_i32_1 : i32, i32, i32
  }
  func.func @transform_3(%arg0: i32) -> (i32, i32) {
    %c0_i32 = arith.constant 0 : i32
    %c0_i32_0 = arith.constant 0 : i32
    return %arg0, %c0_i32 : i32, i32
  }
}

</mosaic_0001>

<bundles_post_ra>
// kernel: _mlp_forward.1
= control target key start
LH: loop header
LB: loop body
LE: loop exit
PB: predicated region body
PF: predicated region fallthrough
CT: control target
= control target key end

     0   :  { %s2289_s12 = smov 0   ;;  %s2291_s13 = smov 0   ;;  %s2903_s0 = inlined_call_operand.vmem [shape: f32[1000,32], index: 0, kind: input, shape index: {}]   ;;  %s2904_s1 = inlined_call_operand.vmem [shape: bf16[3,128,128], index: 1, kind: input, shape index: {}]   ;;  %s2905_s2 = inlined_call_operand.vmem [shape: f32[3,1,128], index: 2, kind: input, shape index: {}]   ;;  %s2906_s3 = inlined_call_operand.vmem [shape: bf16[1000,128], index: 3, kind: output, shape index: {}]  }
   0x1   :  { %s2293_s14 = smov 0  }
   0x2 LB: > { %s2302_s15 = sadd.s32 4294967295, %s2235_s14   ;;  %s2304_s16 = sadd.s32 1, %s2235_s14   ;;  %s2235_s14 = sphi %s2293_s14, %s2915_s14   ;;  %s2231_s13 = sphi %s2291_s13, %s2914_s13   ;;  %s2227_s12 = sphi %s2289_s12, %s2913_s12  }
   0x3   : > { %s85_s17 = ssub.s32 %s2235_s14, %s2304_s16  ;;  %s88_s18 = sadd.s32 1, %s2231_s13 }
   0x4   : > { %p86_p0 = scmp.eq.s32.totalorder %s85_s17, 0  ;;  %p98_p1 = scmp.ne.s32.totalorder %s2231_s13, %s2227_s12 }
   0x5   : > { %p99_p2 = scmp.eq.s32.totalorder %s2302_s15, 1  ;;  %p1708_p3 = scmp.ge.s32.totalorder %s2235_s14, 1 }
   0x6   : > { %s2312_s19 = scalar_select %p86_p0, %s2231_s13, %s88_s18  }
   0x7   : > { %p2314_p4 = por %p99_p2, %p98_p1  ;;  %p146_p5 = scmp.lt.s32.totalorder %s2235_s14, 3 }
   0x9   : > { %p147_p6 = pnand %p1708_p3, %p146_p5 }
   0xa   : > { %s2322_s23 = smul.u32 (!%p147_p6), 63, %s2302_s15  ;;  %s170_s28 = sand.u32 (!%p147_p6), 1, %s2227_s12  }
   0xb   : > { %150 = sbr.rel (%p147_p6) target bundleno = 1010 (0x3f2), region = 32 }
   0xc   : > { %p178_p7 = scmp.lt.s32.totalorder (!%p147_p6), %s2322_s23, 124  ;;  %s2087_s5 = smul.u32 (!%p147_p6), 252, %s170_s28 }
   0xe   : > { %s2580_s12 = scalar_lea.vmem (!%p147_p6), [#allocation2], %s2087_s5  }
  0x10   : > { %v1864_v0 = vld [vmem:[%s2904_s1 + $0x8] sm:$0xff]  ;;  %v1863_v1 = vld [vmem:[%s2904_s1] sm:$0xff]  ;;  %s179_s26 = scalar_select %p178_p7, %s2322_s23, 124  ;;  %vm308_vm0 = vcmask 261120   ;;  %v1872_v17 = vld [vmem:[%s2904_s1 + $0x78] sm:$0xff] }
  0x11   : > { %411 = vmatpush.bf16.msra.mxu0 %v1864_v0  ;;  %2069 = vmatpush.bf16.msra.mxu3 %v1864_v0  ;;  %v1871_v21 = vld [vmem:[%s2904_s1 + $0x70] sm:$0xff]  ;;  %v1870_v22 = vld [vmem:[%s2904_s1 + $0x68] sm:$0xff]  ;;  %v1869_v23 = vld [vmem:[%s2904_s1 + $0x60] sm:$0xff]  ;;  %s1373_s9 = ssub.s32 (%p2314_p4), 125, %s2322_s23  ;;  %s1881_s10 = smul.u32 (%p2314_p4), 252, %s2302_s15 }
  0x12   : > { %s1709_s27 = sshll.u32 %s179_s26, 3  ;;  %738 = vmatpush.bf16.msra.mxu1 %v1872_v17  ;;  %v1868_v26 = vld [vmem:[%s2904_s1 + $0x58] sm:$0xff]  ;;  %v1867_v28 = vld [vmem:[%s2904_s1 + $0x50] sm:$0xff]  ;;  %v1866_v29 = vld [vmem:[%s2904_s1 + $0x48] sm:$0xff]  ;;  %p1374_p8 = scmp.lt.s32.totalorder (%p2314_p4), %s1373_s9, 63 }
  0x13   : > { %s2332_s30 = scalar_lea.vmem %s2903_s0, %s1709_s27  ;;  %v1865_v30 = vld [vmem:[%s2904_s1 + $0x40] sm:$0xff]  ;;  %s2768_s17 = scalar_lea.vmem (%p2314_p4), %s2906_s3, %s1881_s10  }
  0x14   : > { %v193_v2 = vld [vmem:[%s2332_s30] sm:$0xff]  ;;  %v194_v3 = vld [vmem:[%s2332_s30 + $0x8] sm:$0xff]  ;;  %v195_v5 = vld [vmem:[%s2332_s30 + $0x10] sm:$0xff] }
  0x15   : > { %412 = vmatpush.bf16.msra.mxu0 %v1863_v1  ;;  %2070 = vmatpush.bf16.msra.mxu3 %v1863_v1  ;;  %v256_v4 = vpack.c.bf16 %v194_v3, %v193_v2  ;;  %v196_v6 = vld [vmem:[%s2332_s30 + $0x18] sm:$0xff]  ;;  %v197_v8 = vld [vmem:[%s2332_s30 + $0x20] sm:$0xff]  ;;  %v198_v9 = vld [vmem:[%s2332_s30 + $0x28] sm:$0xff] }
  0x16   : > { %v257_v7 = vpack.c.bf16 %v196_v6, %v195_v5  ;;  %v258_v10 = vpack.c.bf16 %v198_v9, %v197_v8  ;;  %v199_v11 = vld [vmem:[%s2332_s30 + $0x30] sm:$0xff]  ;;  %v200_v12 = vld [vmem:[%s2332_s30 + $0x38] sm:$0xff]  ;;  %v201_v14 = vld [vmem:[%s2332_s30 + $0x40] sm:$0xff]  ;;  %739 = vmatpush.bf16.msra.mxu1 %v1871_v21 }
  0x17   : > { %v259_v13 = vpack.c.bf16 %v200_v12, %v199_v11  ;;  %v202_v15 = vld [vmem:[%s2332_s30 + $0x48] sm:$0xff]  ;;  %v203_v18 = vld [vmem:[%s2332_s30 + $0x50] sm:$0xff]  ;;  %v204_v19 = vld [vmem:[%s2332_s30 + $0x58] sm:$0xff] }
  0x18   : > { %1718 = vmatmul.msk.bf16.vlgmr.msra.gmra.mxu0 %vm308_vm0, %v256_v4  ;;  %v260_v16 = vpack.c.bf16 %v202_v15, %v201_v14  ;;  %v261_v20 = vpack.c.bf16 %v204_v19, %v203_v18  ;;  %v205_v24 = vld [vmem:[%s2332_s30 + $0x60] sm:$0xff]  ;;  %v206_v25 = vld [vmem:[%s2332_s30 + $0x68] sm:$0xff]  ;;  %v207_v31 = vld [vmem:[%s2332_s30 + $0x70] sm:$0xff] }
  0x19   : > { %2071 = vmatpush.bf16.msrb.mxu3 %v1872_v17  ;;  %v262_v27 = vpack.c.bf16 %v206_v25, %v205_v24  ;;  %v208_v32 = vld [vmem:[%s2332_s30 + $0x78] sm:$0xff]  ;;  %v209_v34 = vld [vmem:[%s2332_s30 + $0x80] sm:$0xff]  ;;  %v210_v35 = vld [vmem:[%s2332_s30 + $0x88] sm:$0xff] }
  0x1a   : > { %740 = vmatpush.bf16.msra.mxu1 %v1870_v22  ;;  %v263_v33 = vpack.c.bf16 %v208_v32, %v207_v31  ;;  %v264_v36 = vpack.c.bf16 %v210_v35, %v209_v34  ;;  %v2387_v38 = vld [vmem:[%s2905_s2] ss:$0 sm:$0xff]  ;;  %v211_v44 = vld [vmem:[%s2332_s30 + $0x90] sm:$0xff]  ;;  %v212_v45 = vld [vmem:[%s2332_s30 + $0x98] sm:$0xff] }
  0x1b   : > { %v265_v47 = vpack.c.bf16 %v212_v45, %v211_v44  ;;  %v213_v54 = vld [vmem:[%s2332_s30 + $0xa0] sm:$0xff]  ;;  %v214_v55 = vld [vmem:[%s2332_s30 + $0xa8] sm:$0xff]  ;;  %v215_v0 = vld [vmem:[%s2332_s30 + $0xb0] sm:$0xff] }
  0x1c   : > { %v266_v57 = vpack.c.bf16 %v214_v55, %v213_v54  ;;  %v216_v1 = vld [vmem:[%s2332_s30 + $0xb8] sm:$0xff]  ;;  %v218_v11 = vld [vmem:[%s2332_s30 + $0xc8] sm:$0xff]  ;;  %v221_v31 = vld [vmem:[%s2332_s30 + $0xe0] sm:$0xff] }
  0x1d   : > { %2072 = vmatpush.bf16.msrb.mxu3 %v1871_v21  ;;  %v267_v3 = vpack.c.bf16 %v216_v1, %v215_v0  ;;  %v220_v21 = vld [vmem:[%s2332_s30 + $0xd8] sm:$0xff]  ;;  %v222_v32 = vld [vmem:[%s2332_s30 + $0xe8] sm:$0xff]  ;;  %v2428_v34 = vld [vmem:[%s2904_s1 + $0xb0] sm:$0xff] }
  0x1e   : > { %741 = vmatpush.bf16.msra.mxu1 %v1869_v23  ;;  %v270_v35 = vpack.c.bf16 %v222_v32, %v221_v31 }
  0x21   : > { %2073 = vmatpush.bf16.msrb.mxu3 %v1870_v22 }
  0x22   : > { %742 = vmatpush.bf16.msra.mxu1 %v1868_v26 }
  0x25   : > { %2074 = vmatpush.bf16.msrb.mxu3 %v1869_v23 }
  0x26   : > { %743 = vmatpush.bf16.msra.mxu1 %v1867_v28 }
  0x28   : > { %1719 = vmatmul.msk.bf16.gmra.mxu0 %vm308_vm0, %v257_v7 }
  0x29   : > { %2075 = vmatpush.bf16.msrb.mxu3 %v1868_v26 }
  0x2a   : > { %744 = vmatpush.bf16.msra.mxu1 %v1866_v29 }
  0x2d   : > { %2076 = vmatpush.bf16.msrb.mxu3 %v1867_v28  ;;  %v2420_v28 = vld [vmem:[%s2904_s1 + $0xb8] sm:$0xff] }
  0x2e   : > { %745 = vmatpush.bf16.msra.mxu1 %v1865_v30  ;;  %1071 = vmatpush.bf16.msra.mxu2 %v2420_v28 }
  0x31   : > { %2077 = vmatpush.bf16.msrb.mxu3 %v1866_v29 }
  0x32   : > { %1072 = vmatpush.bf16.msra.mxu2 %v2428_v34 }
  0x35   : > { %2078 = vmatpush.bf16.msrb.mxu3 %v1865_v30 }
  0x38   : > { %1720 = vmatmul.msk.bf16.gmra.mxu0 %vm308_vm0, %v258_v10  ;;  %v217_v10 = vld [vmem:[%s2332_s30 + $0xc0] sm:$0xff] }
  0x48   : > { %1721 = vmatmul.msk.bf16.gmra.mxu0 %vm308_vm0, %v259_v13  ;;  %v268_v13 = vpack.c.bf16 %v218_v11, %v217_v10 }
  0x58   : > { %1722 = vmatmul.msk.bf16.gmra.mxu0 %vm308_vm0, %v260_v16 }
  0x68   : > { %1723 = vmatmul.msk.bf16.gmra.mxu0 %vm308_vm0, %v261_v20  ;;  %v219_v20 = vld [vmem:[%s2332_s30 + $0xd0] sm:$0xff] }
  0x69   : > { %v269_v23 = vpack.c.bf16 %v220_v21, %v219_v20 }
  0x78   : > { %1724 = vmatmul.msk.bf16.gmra.mxu0 %vm308_vm0, %v262_v27 }
  0x88   : > { %1725 = vmatmul.msk.bf16.gmra.mxu0 %vm308_vm0, %v263_v33 }
  0x95   : > { %v414_v37 = vpop.f32.mrf.mxu0 }
  0x96   : > { %v415_v39 = vadd.f32 %v2387_v38, %v414_v37  ;;  %v2434_v37 = vld [vmem:[%s2904_s1 + $0xa8] sm:$0xff] }
  0x97   : > { %1073 = vmatpush.bf16.msra.mxu2 %v2434_v37 }
  0x98   : > { %1726 = vmatmul.msk.bf16.gmra.mxu0 %vm308_vm0, %v264_v36  ;;  %v573_v42 = vmax.f32 %v415_v39, 0.0  ;;  %v2441_v39 = vld [vmem:[%s2904_s1 + $0xa0] sm:$0xff] }
  0x9b   : > { %1074 = vmatpush.bf16.msra.mxu2 %v2441_v39 }
  0x9d   : > { %v416_v40 = vpop.f32.mrf.mxu0 }
  0x9e   : > { %v417_v41 = vadd.f32 %v2387_v38, %v416_v40 }
  0xa0   : > { %v574_v43 = vmax.f32 %v417_v41, 0.0 }
  0xa2   : > { %v636_v46 = vpack.c.bf16 %v574_v43, %v573_v42  ;;  %v2449_v43 = vld [vmem:[%s2904_s1 + $0x98] sm:$0xff] }
  0xa3   : > { %1075 = vmatpush.bf16.msra.mxu2 %v2449_v43 }
  0xa4   : > { %746 = vmatmul.bf16.vlgmr.msra.gmra.mxu1 %v636_v46  ;;  %v223_v46 = vld [vmem:[%s2332_s30 + $0xf0] sm:$0xff] }
  0xa5   : > { %v419_v48 = vpop.f32.mrf.mxu0 }
  0xa6   : > { %v420_v49 = vadd.f32 %v2387_v38, %v419_v48 }
  0xa8   : > { %1727 = vmatmul.msk.bf16.gmra.mxu0 %vm308_vm0, %v265_v47  ;;  %v575_v52 = vmax.f32 %v420_v49, 0.0  ;;  %v224_v47 = vld [vmem:[%s2332_s30 + $0xf8] sm:$0xff]  ;;  %v2457_v49 = vld [vmem:[%s2904_s1 + $0x90] sm:$0xff] }
  0xa9   : > { %1076 = vmatpush.bf16.msra.mxu2 %v2457_v49 }
  0xad   : > { %v421_v50 = vpop.f32.mrf.mxu0 }
  0xae   : > { %v422_v51 = vadd.f32 %v2387_v38, %v421_v50  ;;  %v271_v50 = vpack.c.bf16 %v224_v47, %v223_v46  ;;  %v231_v47 = vld [vmem:[%s2332_s30 + $0x130] sm:$0xff] }
  0xb0   : > { %v576_v53 = vmax.f32 %v422_v51, 0.0 }
  0xb2   : > { %v637_v56 = vpack.c.bf16 %v576_v53, %v575_v52  ;;  %v2463_v52 = vld [vmem:[%s2904_s1 + $0x88] sm:$0xff]  ;;  %v2470_v53 = vld [vmem:[%s2904_s1 + $0x80] sm:$0xff] }
  0xb3   : > { %1077 = vmatpush.bf16.msra.mxu2 %v2463_v52 }
  0xb4   : > { %751 = vmatmul.bf16.gmra.mxu1 %v637_v56 }
  0xb5   : > { %v424_v58 = vpop.f32.mrf.mxu0 }
  0xb6   : > { %v425_v59 = vadd.f32 %v2387_v38, %v424_v58 }
  0xb7   : > { %1078 = vmatpush.bf16.msra.mxu2 %v2470_v53 }
  0xb8   : > { %1728 = vmatmul.msk.bf16.gmra.mxu0 %vm308_vm0, %v266_v57  ;;  %v577_v62 = vmax.f32 %v425_v59, 0.0  ;;  %v225_v59 = vld [vmem:[%s2332_s30 + $0x100] sm:$0xff] }
  0xbd   : > { %v426_v60 = vpop.f32.mrf.mxu0 }
  0xbe   : > { %v427_v61 = vadd.f32 %v2387_v38, %v426_v60  ;;  %v226_v60 = vld [vmem:[%s2332_s30 + $0x108] sm:$0xff] }
  0xc0   : > { %v578_v63 = vmax.f32 %v427_v61, 0.0 }
  0xc2   : > { %v638_v2 = vpack.c.bf16 %v578_v63, %v577_v62  ;;  %v272_v62 = vpack.c.bf16 %v226_v60, %v225_v59 }
  0xc4   : > { %756 = vmatmul.bf16.gmra.mxu1 %v638_v2 }
  0xc5   : > { %v429_v4 = vpop.f32.mrf.mxu0 }
  0xc6   : > { %v430_v5 = vadd.f32 %v2387_v38, %v429_v4 }
  0xc8   : > { %1729 = vmatmul.msk.bf16.gmra.mxu0 %vm308_vm0, %v267_v3  ;;  %v579_v8 = vmax.f32 %v430_v5, 0.0 }
  0xcd   : > { %v431_v6 = vpop.f32.mrf.mxu0 }
  0xce   : > { %v432_v7 = vadd.f32 %v2387_v38, %v431_v6  ;;  %v227_v6 = vld [vmem:[%s2332_s30 + $0x110] sm:$0xff] }
  0xd0   : > { %v580_v9 = vmax.f32 %v432_v7, 0.0  ;;  %v228_v7 = vld [vmem:[%s2332_s30 + $0x118] sm:$0xff] }
  0xd1   : > { %v273_v10 = vpack.c.bf16 %v228_v7, %v227_v6 }
  0xd2   : > { %v639_v12 = vpack.c.bf16 %v580_v9, %v579_v8  ;;  %v2485_v9 = vld [vmem:[%s2905_s2 + $0x1] ss:$0 sm:$0xff] }
  0xd4   : > { %761 = vmatmul.bf16.gmra.mxu1 %v639_v12 }
  0xd5   : > { %v434_v14 = vpop.f32.mrf.mxu0 }
  0xd6   : > { %v435_v15 = vadd.f32 %v2387_v38, %v434_v14 }
  0xd8   : > { %1730 = vmatmul.msk.bf16.gmra.mxu0 %vm308_vm0, %v268_v13  ;;  %v581_v18 = vmax.f32 %v435_v15, 0.0 }
  0xdd   : > { %v436_v16 = vpop.f32.mrf.mxu0 }
  0xde   : > { %v437_v17 = vadd.f32 %v2387_v38, %v436_v16 }
  0xe0   : > { %v582_v19 = vmax.f32 %v437_v17, 0.0 }
  0xe2   : > { %v640_v22 = vpack.c.bf16 %v582_v19, %v581_v18 }
  0xe4   : > { %766 = vmatmul.bf16.gmra.mxu1 %v640_v22 }
  0xe5   : > { %v439_v24 = vpop.f32.mrf.mxu0 }
  0xe6   : > { %v440_v25 = vadd.f32 %v2387_v38, %v439_v24  ;;  %v229_v24 = vld [vmem:[%s2332_s30 + $0x120] sm:$0xff] }
  0xe8   : > { %1731 = vmatmul.msk.bf16.gmra.mxu0 %vm308_vm0, %v269_v23  ;;  %v583_v29 = vmax.f32 %v440_v25, 0.0  ;;  %v230_v25 = vld [vmem:[%s2332_s30 + $0x128] sm:$0xff] }
  0xed   : > { %v441_v26 = vpop.f32.mrf.mxu0 }
  0xee   : > { %v442_v27 = vadd.f32 %v2387_v38, %v441_v26 }
  0xf0   : > { %v584_v30 = vmax.f32 %v442_v27, 0.0  ;;  %v274_v27 = vpack.c.bf16 %v230_v25, %v229_v24 }
  0xf2   : > { %v641_v33 = vpack.c.bf16 %v584_v30, %v583_v29 }
  0xf4   : > { %771 = vmatmul.bf16.gmra.mxu1 %v641_v33 }
  0xf5   : > { %v444_v36 = vpop.f32.mrf.mxu0 }
  0xf6   : > { %v445_v40 = vadd.f32 %v2387_v38, %v444_v36 }
  0xf8   : > { %1732 = vmatmul.msk.bf16.gmra.mxu0 %vm308_vm0, %v270_v35  ;;  %v585_v44 = vmax.f32 %v445_v40, 0.0 }
  0xfd   : > { %v446_v41 = vpop.f32.mrf.mxu0 }
  0xfe   : > { %v447_v42 = vadd.f32 %v2387_v38, %v446_v41 }
 0x100   : > { %v586_v45 = vmax.f32 %v447_v42, 0.0 }
 0x102   : > { %v642_v48 = vpack.c.bf16 %v586_v45, %v585_v44 }
 0x104   : > { %776 = vmatmul.bf16.gmra.mxu1 %v642_v48  ;;  %v232_v48 = vld [vmem:[%s2332_s30 + $0x138] sm:$0xff] }
 0x105   : > { %v449_v51 = vpop.f32.mrf.mxu0 }
 0x106   : > { %v450_v54 = vadd.f32 %v2387_v38, %v449_v51  ;;  %v275_v51 = vpack.c.bf16 %v232_v48, %v231_v47 }
 0x108   : > { %1733 = vmatmul.msk.bf16.gmra.mxu0 %vm308_vm0, %v271_v50  ;;  %v587_v57 = vmax.f32 %v450_v54, 0.0 }
 0x10d   : > { %v451_v55 = vpop.f32.mrf.mxu0 }
 0x10e   : > { %v452_v56 = vadd.f32 %v2387_v38, %v451_v55 }
 0x110   : > { %v588_v58 = vmax.f32 %v452_v56, 0.0 }
 0x112   : > { %v643_v61 = vpack.c.bf16 %v588_v58, %v587_v57 }
 0x114   : > { %781 = vmatmul.bf16.gmra.mxu1 %v643_v61 }
 0x115   : > { %v454_v63 = vpop.f32.mrf.mxu0 }
 0x116   : > { %v455_v0 = vadd.f32 %v2387_v38, %v454_v63 }
 0x118   : > { %1734 = vmatmul.msk.bf16.gmra.mxu0 %vm308_vm0, %v272_v62  ;;  %v589_v3 = vmax.f32 %v455_v0, 0.0 }
 0x11d   : > { %v456_v1 = vpop.f32.mrf.mxu0 }
 0x11e   : > { %v457_v2 = vadd.f32 %v2387_v38, %v456_v1 }
 0x120   : > { %v590_v4 = vmax.f32 %v457_v2, 0.0 }
 0x121   : > { %v747_v5 = vpop.f32.mrf.mxu1 }
 0x122   : > { %v644_v8 = vpack.c.bf16 %v590_v4, %v589_v3  ;;  %v748_v12 = vadd.f32 %v2485_v9, %v747_v5  ;;  %v233_v3 = vld [vmem:[%s2332_s30 + $0x140] sm:$0xff]  ;;  %v234_v4 = vld [vmem:[%s2332_s30 + $0x148] sm:$0xff] }
 0x123   : > { %v276_v6 = vpack.c.bf16 %v234_v4, %v233_v3  ;;  %v239_v3 = vld [vmem:[%s2332_s30 + $0x170] sm:$0xff]  ;;  %v240_v4 = vld [vmem:[%s2332_s30 + $0x178] sm:$0xff] }
 0x124   : > { %786 = vmatmul.bf16.gmra.mxu1 %v644_v8  ;;  %v906_v15 = vmax.f32 %v748_v12, 0.0 }
 0x125   : > { %v459_v11 = vpop.f32.mrf.mxu0 }
 0x126   : > { %v460_v16 = vadd.f32 %v2387_v38, %v459_v11 }
 0x128   : > { %1735 = vmatmul.msk.bf16.gmra.mxu0 %vm308_vm0, %v273_v10  ;;  %v591_v21 = vmax.f32 %v460_v16, 0.0 }
 0x129   : > { %v749_v13 = vpop.f32.mrf.mxu1 }
 0x12a   : > { %v750_v14 = vadd.f32 %v2485_v9, %v749_v13 }
 0x12c   : > { %v907_v17 = vmax.f32 %v750_v14, 0.0 }
 0x12d   : > { %v461_v18 = vpop.f32.mrf.mxu0 }
 0x12e   : > { %v462_v19 = vadd.f32 %v2387_v38, %v461_v18  ;;  %v969_v20 = vpack.c.bf16 %v907_v17, %v906_v15 }
 0x130   : > { %v592_v22 = vmax.f32 %v462_v19, 0.0  ;;  %1079 = vmatmul.bf16.vlgmr.msra.gmra.mxu2 %v969_v20 }
 0x131   : > { %v752_v23 = vpop.f32.mrf.mxu1 }
 0x132   : > { %v645_v26 = vpack.c.bf16 %v592_v22, %v591_v21  ;;  %v753_v30 = vadd.f32 %v2485_v9, %v752_v23  ;;  %v235_v21 = vld [vmem:[%s2332_s30 + $0x150] sm:$0xff]  ;;  %v236_v22 = vld [vmem:[%s2332_s30 + $0x158] sm:$0xff] }
 0x133   : > { %v277_v24 = vpack.c.bf16 %v236_v22, %v235_v21  ;;  %v242_v21 = vld [vmem:[%s2332_s30 + $0x188] sm:$0xff] }
 0x134   : > { %791 = vmatmul.bf16.gmra.mxu1 %v645_v26  ;;  %v908_v33 = vmax.f32 %v753_v30, 0.0 }
 0x135   : > { %v464_v29 = vpop.f32.mrf.mxu0 }
 0x136   : > { %v465_v35 = vadd.f32 %v2387_v38, %v464_v29 }
 0x138   : > { %1736 = vmatmul.msk.bf16.gmra.mxu0 %vm308_vm0, %v274_v27  ;;  %v593_v44 = vmax.f32 %v465_v35, 0.0 }
 0x139   : > { %v754_v31 = vpop.f32.mrf.mxu1 }
 0x13a   : > { %v755_v32 = vadd.f32 %v2485_v9, %v754_v31 }
 0x13c   : > { %v909_v36 = vmax.f32 %v755_v32, 0.0 }
 0x13d   : > { %v466_v40 = vpop.f32.mrf.mxu0 }
 0x13e   : > { %v467_v41 = vadd.f32 %v2387_v38, %v466_v40  ;;  %v970_v42 = vpack.c.bf16 %v909_v36, %v908_v33 }
 0x140   : > { %v594_v45 = vmax.f32 %v467_v41, 0.0  ;;  %1084 = vmatmul.bf16.gmra.mxu2 %v970_v42 }
 0x141   : > { %v757_v46 = vpop.f32.mrf.mxu1 }
 0x142   : > { %v646_v50 = vpack.c.bf16 %v594_v45, %v593_v44  ;;  %v758_v55 = vadd.f32 %v2485_v9, %v757_v46  ;;  %v237_v44 = vld [vmem:[%s2332_s30 + $0x160] sm:$0xff]  ;;  %v238_v45 = vld [vmem:[%s2332_s30 + $0x168] sm:$0xff] }
 0x143   : > { %v278_v47 = vpack.c.bf16 %v238_v45, %v237_v44  ;;  %v249_v44 = vld [vmem:[%s2332_s30 + $0x1c0] sm:$0xff]  ;;  %v250_v45 = vld [vmem:[%s2332_s30 + $0x1c8] sm:$0xff] }
 0x144   : > { %796 = vmatmul.bf16.gmra.mxu1 %v646_v50  ;;  %v910_v58 = vmax.f32 %v758_v55, 0.0  ;;  %v243_v50 = vld [vmem:[%s2332_s30 + $0x190] sm:$0xff] }
 0x145   : > { %v469_v54 = vpop.f32.mrf.mxu0 }
 0x146   : > { %v470_v59 = vadd.f32 %v2387_v38, %v469_v54 }
 0x148   : > { %1737 = vmatmul.msk.bf16.gmra.mxu0 %vm308_vm0, %v275_v51  ;;  %v595_v0 = vmax.f32 %v470_v59, 0.0  ;;  %v244_v51 = vld [vmem:[%s2332_s30 + $0x198] sm:$0xff] }
 0x149   : > { %v759_v56 = vpop.f32.mrf.mxu1  ;;  %v281_v55 = vpack.c.bf16 %v244_v51, %v243_v50 }
 0x14a   : > { %v760_v57 = vadd.f32 %v2485_v9, %v759_v56 }
 0x14b   : > { %1743 = vmatmul.msk.bf16.vlgmr.msra.gmra.mxu3 %vm308_vm0, %v281_v55 }
 0x14c   : > { %v911_v60 = vmax.f32 %v760_v57, 0.0  ;;  %2079 = vmatpush.bf16.msra.mxu3 %v2420_v28  ;;  %v279_v28 = vpack.c.bf16 %v240_v4, %v239_v3  ;;  %v252_v3 = vld [vmem:[%s2332_s30 + $0x1d8] sm:$0xff]  ;;  %v2572_v4 = vld [vmem:[%s2905_s2 + $0x2] ss:$0 sm:$0xff] }
 0x14d   : > { %v471_v61 = vpop.f32.mrf.mxu0 }
 0x14e   : > { %v472_v62 = vadd.f32 %v2387_v38, %v471_v61  ;;  %v971_v63 = vpack.c.bf16 %v911_v60, %v910_v58 }
 0x150   : > { %v596_v1 = vmax.f32 %v472_v62, 0.0  ;;  %1089 = vmatmul.bf16.gmra.mxu2 %v971_v63  ;;  %2080 = vmatpush.bf16.msra.mxu3 %v2428_v34 }
 0x151   : > { %v762_v2 = vpop.f32.mrf.mxu1 }
 0x152   : > { %v647_v5 = vpack.c.bf16 %v596_v1, %v595_v0  ;;  %v763_v8 = vadd.f32 %v2485_v9, %v762_v2 }
 0x154   : > { %801 = vmatmul.bf16.gmra.mxu1 %v647_v5  ;;  %v912_v12 = vmax.f32 %v763_v8, 0.0  ;;  %2081 = vmatpush.bf16.msra.mxu3 %v2434_v37  ;;  %v246_v8 = vld [vmem:[%s2332_s30 + $0x1a8] sm:$0xff] }
 0x155   : > { %v474_v7 = vpop.f32.mrf.mxu0 }
 0x156   : > { %v475_v13 = vadd.f32 %v2387_v38, %v474_v7  ;;  %v245_v7 = vld [vmem:[%s2332_s30 + $0x1a0] sm:$0xff] }
 0x157   : > { %v282_v34 = vpack.c.bf16 %v246_v8, %v245_v7 }
 0x158   : > { %1738 = vmatmul.msk.bf16.gmra.mxu0 %vm308_vm0, %v276_v6  ;;  %v597_v18 = vmax.f32 %v475_v13, 0.0  ;;  %2082 = vmatpush.bf16.msra.mxu3 %v2441_v39 }
 0x159   : > { %v764_v10 = vpop.f32.mrf.mxu1 }
 0x15a   : > { %v765_v11 = vadd.f32 %v2485_v9, %v764_v10 }
 0x15b   : > { %1744 = vmatmul.msk.bf16.gmra.mxu3 %vm308_vm0, %v282_v34 }
 0x15c   : > { %v913_v14 = vmax.f32 %v765_v11, 0.0  ;;  %2083 = vmatpush.bf16.msra.mxu3 %v2449_v43 }
 0x15d   : > { %v476_v15 = vpop.f32.mrf.mxu0 }
 0x15e   : > { %v477_v16 = vadd.f32 %v2387_v38, %v476_v15  ;;  %v972_v17 = vpack.c.bf16 %v913_v14, %v912_v12 }
 0x160   : > { %v598_v19 = vmax.f32 %v477_v16, 0.0  ;;  %1094 = vmatmul.bf16.gmra.mxu2 %v972_v17  ;;  %2084 = vmatpush.bf16.msra.mxu3 %v2457_v49 }
 0x161   : > { %v767_v20 = vpop.f32.mrf.mxu1 }
 0x162   : > { %v648_v23 = vpack.c.bf16 %v598_v19, %v597_v18  ;;  %v768_v26 = vadd.f32 %v2485_v9, %v767_v20  ;;  %v241_v20 = vld [vmem:[%s2332_s30 + $0x180] sm:$0xff] }
 0x163   : > { %v280_v43 = vpack.c.bf16 %v242_v21, %v241_v20 }
 0x164   : > { %806 = vmatmul.bf16.gmra.mxu1 %v648_v23  ;;  %v914_v30 = vmax.f32 %v768_v26, 0.0  ;;  %2085 = vmatpush.bf16.msra.mxu3 %v2463_v52 }
 0x165   : > { %v479_v25 = vpop.f32.mrf.mxu0 }
 0x166   : > { %v480_v31 = vadd.f32 %v2387_v38, %v479_v25  ;;  %v248_v25 = vld [vmem:[%s2332_s30 + $0x1b8] sm:$0xff] }
 0x168   : > { %1739 = vmatmul.msk.bf16.gmra.mxu0 %vm308_vm0, %v277_v24  ;;  %v599_v40 = vmax.f32 %v480_v31, 0.0  ;;  %v247_v24 = vld [vmem:[%s2332_s30 + $0x1b0] sm:$0xff]  ;;  %2086 = vmatpush.bf16.msra.mxu3 %v2470_v53 }
 0x169   : > { %v769_v27 = vpop.f32.mrf.mxu1  ;;  %v283_v49 = vpack.c.bf16 %v248_v25, %v247_v24 }
 0x16a   : > { %v770_v29 = vadd.f32 %v2485_v9, %v769_v27 }
 0x16b   : > { %1745 = vmatmul.msk.bf16.gmra.mxu3 %vm308_vm0, %v283_v49 }
 0x16c   : > { %v915_v32 = vmax.f32 %v770_v29, 0.0 }
 0x16d   : > { %v481_v33 = vpop.f32.mrf.mxu0 }
 0x16e   : > { %v482_v35 = vadd.f32 %v2387_v38, %v481_v33  ;;  %v973_v36 = vpack.c.bf16 %v915_v32, %v914_v30 }
 0x170   : > { %v600_v41 = vmax.f32 %v482_v35, 0.0  ;;  %1099 = vmatmul.bf16.gmra.mxu2 %v973_v36 }
 0x171   : > { %v772_v42 = vpop.f32.mrf.mxu1 }
 0x172   : > { %v649_v46 = vpack.c.bf16 %v600_v41, %v599_v40  ;;  %v773_v54 = vadd.f32 %v2485_v9, %v772_v42 }
 0x174   : > { %811 = vmatmul.bf16.gmra.mxu1 %v649_v46  ;;  %v916_v58 = vmax.f32 %v773_v54, 0.0 }
 0x175   : > { %v484_v48 = vpop.f32.mrf.mxu0 }
 0x176   : > { %v485_v59 = vadd.f32 %v2387_v38, %v484_v48 }
 0x178   : > { %1740 = vmatmul.msk.bf16.gmra.mxu0 %vm308_vm0, %v278_v47  ;;  %v601_v0 = vmax.f32 %v485_v59, 0.0  ;;  %v284_v47 = vpack.c.bf16 %v250_v45, %v249_v44 }
 0x179   : > { %v774_v56 = vpop.f32.mrf.mxu1 }
 0x17a   : > { %v775_v57 = vadd.f32 %v2485_v9, %v774_v56 }
 0x17b   : > { %1746 = vmatmul.msk.bf16.gmra.mxu3 %vm308_vm0, %v284_v47 }
 0x17c   : > { %v917_v60 = vmax.f32 %v775_v57, 0.0 }
 0x17d   : > { %v486_v61 = vpop.f32.mrf.mxu0 }
 0x17e   : > { %v487_v62 = vadd.f32 %v2387_v38, %v486_v61  ;;  %v974_v63 = vpack.c.bf16 %v917_v60, %v916_v58 }
 0x180   : > { %v602_v1 = vmax.f32 %v487_v62, 0.0  ;;  %1104 = vmatmul.bf16.gmra.mxu2 %v974_v63 }
 0x181   : > { %v777_v2 = vpop.f32.mrf.mxu1 }
 0x182   : > { %v650_v5 = vpack.c.bf16 %v602_v1, %v601_v0  ;;  %v778_v10 = vadd.f32 %v2485_v9, %v777_v2  ;;  %v251_v2 = vld [vmem:[%s2332_s30 + $0x1d0] sm:$0xff] }
 0x184   : > { %816 = vmatmul.bf16.gmra.mxu1 %v650_v5  ;;  %v918_v37 = vmax.f32 %v778_v10, 0.0  ;;  %v285_v5 = vpack.c.bf16 %v252_v3, %v251_v2 }
 0x185   : > { %v489_v6 = vpop.f32.mrf.mxu0 }
 0x186   : > { %v490_v13 = vadd.f32 %v2387_v38, %v489_v6 }
 0x188   : > { %1741 = vmatmul.msk.bf16.gmra.mxu0 %vm308_vm0, %v279_v28  ;;  %v603_v17 = vmax.f32 %v490_v13, 0.0 }
 0x189   : > { %v779_v11 = vpop.f32.mrf.mxu1 }
 0x18a   : > { %v780_v12 = vadd.f32 %v2485_v9, %v779_v11 }
 0x18b   : > { %1747 = vmatmul.msk.bf16.gmra.mxu3 %vm308_vm0, %v285_v5  ;;  %v255_v5 = vld [vmem:[%s2332_s30 + $0x1f0] sm:$0xff] }
 0x18c   : > { %v919_v14 = vmax.f32 %v780_v12, 0.0 }
 0x18d   : > { %v491_v39 = vpop.f32.mrf.mxu0 }
 0x18e   : > { %v492_v15 = vadd.f32 %v2387_v38, %v491_v39  ;;  %v975_v16 = vpack.c.bf16 %v919_v14, %v918_v37 }
 0x190   : > { %v604_v18 = vmax.f32 %v492_v15, 0.0  ;;  %1109 = vmatmul.bf16.gmra.mxu2 %v975_v16 }
 0x191   : > { %v782_v19 = vpop.f32.mrf.mxu1 }
 0x192   : > { %v651_v22 = vpack.c.bf16 %v604_v18, %v603_v17  ;;  %v783_v26 = vadd.f32 %v2485_v9, %v782_v19 }
 0x194   : > { %821 = vmatmul.bf16.gmra.mxu1 %v651_v22  ;;  %v920_v52 = vmax.f32 %v783_v26, 0.0  ;;  %v253_v22 = vld [vmem:[%s2332_s30 + $0x1e0] sm:$0xff] }
 0x195   : > { %v494_v23 = vpop.f32.mrf.mxu0 }
 0x196   : > { %v495_v30 = vadd.f32 %v2387_v38, %v494_v23 }
 0x198   : > { %1742 = vmatmul.msk.bf16.gmra.mxu0 %vm308_vm0, %v280_v43  ;;  %v605_v35 = vmax.f32 %v495_v30, 0.0  ;;  %v254_v43 = vld [vmem:[%s2332_s30 + $0x1e8] sm:$0xff] }
 0x199   : > { %v784_v27 = vpop.f32.mrf.mxu1  ;;  %v286_v23 = vpack.c.bf16 %v254_v43, %v253_v22 }
 0x19a   : > { %v785_v29 = vadd.f32 %v2485_v9, %v784_v27 }
 0x19b   : > { %1748 = vmatmul.msk.bf16.gmra.mxu3 %vm308_vm0, %v286_v23 }
 0x19c   : > { %v921_v31 = vmax.f32 %v785_v29, 0.0 }
 0x19d   : > { %v496_v32 = vpop.f32.mrf.mxu0 }
 0x19e   : > { %v497_v33 = vadd.f32 %v2387_v38, %v496_v32  ;;  %v976_v53 = vpack.c.bf16 %v921_v31, %v920_v52 }
 0x1a0   : > { %v606_v36 = vmax.f32 %v497_v33, 0.0  ;;  %1114 = vmatmul.bf16.gmra.mxu2 %v976_v53 }
 0x1a1   : > { %v787_v40 = vpop.f32.mrf.mxu1 }
 0x1a2   : > { %v652_v41 = vpack.c.bf16 %v606_v36, %v605_v35  ;;  %v788_v46 = vadd.f32 %v2485_v9, %v787_v40 }
 0x1a4   : > { %826 = vmatmul.bf16.gmra.mxu1 %v652_v41  ;;  %v922_v51 = vmax.f32 %v788_v46, 0.0 }
 0x1a5   : > { %v499_v42 = vpop.f32.mrf.mxu0 }
 0x1a6   : > { %v500_v54 = vadd.f32 %v2387_v38, %v499_v42 }
 0x1a8   : > { %v607_v59 = vmax.f32 %v500_v54, 0.0 }
 0x1a9   : > { %v789_v48 = vpop.f32.mrf.mxu1 }
 0x1aa   : > { %v790_v50 = vadd.f32 %v2485_v9, %v789_v48 }
 0x1ac   : > { %v923_v55 = vmax.f32 %v790_v50, 0.0 }
 0x1ad   : > { %v501_v56 = vpop.f32.mrf.mxu0 }
 0x1ae   : > { %v502_v57 = vadd.f32 %v2387_v38, %v501_v56  ;;  %v977_v58 = vpack.c.bf16 %v923_v55, %v922_v51 }
 0x1b0   : > { %v608_v60 = vmax.f32 %v502_v57, 0.0  ;;  %1119 = vmatmul.bf16.gmra.mxu2 %v977_v58 }
 0x1b1   : > { %v792_v61 = vpop.f32.mrf.mxu1 }
 0x1b2   : > { %v653_v62 = vpack.c.bf16 %v608_v60, %v607_v59  ;;  %v793_v1 = vadd.f32 %v2485_v9, %v792_v61 }
 0x1b3   : > { %v1080_v63 = vpop.f32.mrf.mxu2 }
 0x1b4   : > { %831 = vmatmul.bf16.gmra.mxu1 %v653_v62  ;;  %v924_v7 = vmax.f32 %v793_v1, 0.0  ;;  %v1081_v10 = vadd.f32 %v2572_v4, %v1080_v63 }
 0x1b5   : > { %v504_v0 = vpop.f32.mrf.mxu0 }
 0x1b6   : > { %v505_v34 = vadd.f32 %v2387_v38, %v504_v0 }
 0x1b8   : > { %v609_v15 = vmax.f32 %v505_v34, 0.0 }
 0x1b9   : > { %v794_v28 = vpop.f32.mrf.mxu1 }
 0x1ba   : > { %v795_v6 = vadd.f32 %v2485_v9, %v794_v28  ;;  %v287_v28 = vpack.c.bf16 %v255_v5, %v255_v5 }
 0x1bb   : > { %v1082_v8 = vpop.f32.mrf.mxu2 }
 0x1bc   : > { %v925_v11 = vmax.f32 %v795_v6, 0.0  ;;  %v1083_v12 = vadd.f32 %v2572_v4, %v1082_v8  ;;  %1749 = vmatmul.msk.bf16.gmra.mxu3 %vm308_vm0, %v287_v28 }
 0x1bd   : > { %v506_v37 = vpop.f32.mrf.mxu0 }
 0x1be   : > { %v1887_v13 = vpack.c.bf16 %v1083_v12, %v1081_v10  ;;  %v507_v14 = vadd.f32 %v2387_v38, %v506_v37  ;;  %v978_v39 = vpack.c.bf16 %v925_v11, %v924_v7 }
 0x1c0   : > { %1888 = vst [vmem:[%s2580_s12] sm:$0xff] %v1887_v13   ;;  %v610_v16 = vmax.f32 %v507_v14, 0.0  ;;  %1124 = vmatmul.bf16.gmra.mxu2 %v978_v39 }
 0x1c1   : > { %v797_v17 = vpop.f32.mrf.mxu1 }
 0x1c2   : > { %v654_v18 = vpack.c.bf16 %v610_v16, %v609_v15  ;;  %v798_v21 = vadd.f32 %v2485_v9, %v797_v17 }
 0x1c3   : > { %v1085_v19 = vpop.f32.mrf.mxu2 }
 0x1c4   : > { %836 = vmatmul.bf16.gmra.mxu1 %v654_v18  ;;  %v926_v26 = vmax.f32 %v798_v21, 0.0  ;;  %v1086_v27 = vadd.f32 %v2572_v4, %v1085_v19 }
 0x1c5   : > { %v509_v20 = vpop.f32.mrf.mxu0 }
 0x1c6   : > { %v510_v29 = vadd.f32 %v2387_v38, %v509_v20 }
 0x1c8   : > { %v611_v35 = vmax.f32 %v510_v29, 0.0 }
 0x1c9   : > { %v799_v24 = vpop.f32.mrf.mxu1 }
 0x1ca   : > { %v800_v25 = vadd.f32 %v2485_v9, %v799_v24 }
 0x1cb   : > { %v1087_v49 = vpop.f32.mrf.mxu2 }
 0x1cc   : > { %v927_v52 = vmax.f32 %v800_v25, 0.0  ;;  %v1088_v30 = vadd.f32 %v2572_v4, %v1087_v49 }
 0x1cd   : > { %v511_v31 = vpop.f32.mrf.mxu0 }
 0x1ce   : > { %v1892_v32 = vpack.c.bf16 %v1088_v30, %v1086_v27  ;;  %v512_v33 = vadd.f32 %v2387_v38, %v511_v31  ;;  %v979_v53 = vpack.c.bf16 %v927_v52, %v926_v26  ;;  %v2614_v30 = vpop.f32.mrf.mxu3 }
 0x1d0   : > { %2039 = vst [vmem:[%s2580_s12 + $0x8] sm:$0xff] %v1892_v32   ;;  %v612_v36 = vmax.f32 %v512_v33, 0.0  ;;  %1129 = vmatmul.bf16.gmra.mxu2 %v979_v53 }
 0x1d1   : > { %v802_v40 = vpop.f32.mrf.mxu1 }
 0x1d2   : > { %v655_v41 = vpack.c.bf16 %v612_v36, %v611_v35  ;;  %v803_v45 = vadd.f32 %v2485_v9, %v802_v40 }
 0x1d3   : > { %v1090_v42 = vpop.f32.mrf.mxu2 }
 0x1d4   : > { %841 = vmatmul.bf16.gmra.mxu1 %v655_v41  ;;  %v928_v48 = vmax.f32 %v803_v45, 0.0  ;;  %v1091_v51 = vadd.f32 %v2572_v4, %v1090_v42 }
 0x1d5   : > { %v514_v44 = vpop.f32.mrf.mxu0 }
 0x1d6   : > { %v515_v54 = vadd.f32 %v2387_v38, %v514_v44  ;;  %v541_v44 = vpop.f32.mrf.mxu3 }
 0x1d8   : > { %v613_v61 = vmax.f32 %v515_v54, 0.0 }
 0x1d9   : > { %v804_v46 = vpop.f32.mrf.mxu1 }
 0x1da   : > { %v805_v47 = vadd.f32 %v2485_v9, %v804_v46 }
 0x1db   : > { %v1092_v50 = vpop.f32.mrf.mxu2 }
 0x1dc   : > { %v929_v55 = vmax.f32 %v805_v47, 0.0  ;;  %v1093_v56 = vadd.f32 %v2572_v4, %v1092_v50 }
 0x1dd   : > { %v516_v57 = vpop.f32.mrf.mxu0 }
 0x1de   : > { %v1897_v58 = vpack.c.bf16 %v1093_v56, %v1091_v51  ;;  %v517_v59 = vadd.f32 %v2387_v38, %v516_v57  ;;  %v980_v60 = vpack.c.bf16 %v929_v55, %v928_v48 }
 0x1e0   : > { %2040 = vst [vmem:[%s2580_s12 + $0x10] sm:$0xff] %v1897_v58   ;;  %v614_v62 = vmax.f32 %v517_v59, 0.0  ;;  %1134 = vmatmul.bf16.gmra.mxu2 %v980_v60  ;;  %v544_v58 = vpop.f32.mrf.mxu3 }
 0x1e1   : > { %v807_v63 = vpop.f32.mrf.mxu1 }
 0x1e2   : > { %v656_v0 = vpack.c.bf16 %v614_v62, %v613_v61  ;;  %v808_v3 = vadd.f32 %v2485_v9, %v807_v63 }
 0x1e3   : > { %v1095_v1 = vpop.f32.mrf.mxu2 }
 0x1e4   : > { %846 = vmatmul.bf16.gmra.mxu1 %v656_v0  ;;  %v930_v8 = vmax.f32 %v808_v3, 0.0  ;;  %v1096_v34 = vadd.f32 %v2572_v4, %v1095_v1 }
 0x1e5   : > { %v519_v2 = vpop.f32.mrf.mxu0 }
 0x1e6   : > { %v520_v11 = vadd.f32 %v2387_v38, %v519_v2 }
 0x1e8   : > { %v615_v16 = vmax.f32 %v520_v11, 0.0  ;;  %v546_v5 = vpop.f32.mrf.mxu3 }
 0x1e9   : > { %v809_v6 = vpop.f32.mrf.mxu1 }
 0x1ea   : > { %v810_v7 = vadd.f32 %v2485_v9, %v809_v6 }
 0x1eb   : > { %v1097_v10 = vpop.f32.mrf.mxu2 }
 0x1ec   : > { %v931_v12 = vmax.f32 %v810_v7, 0.0  ;;  %v1098_v37 = vadd.f32 %v2572_v4, %v1097_v10 }
 0x1ed   : > { %v521_v13 = vpop.f32.mrf.mxu0 }
 0x1ee   : > { %v981_v14 = vpack.c.bf16 %v931_v12, %v930_v8  ;;  %v1902_v39 = vpack.c.bf16 %v1098_v37, %v1096_v34  ;;  %v522_v15 = vadd.f32 %v2387_v38, %v521_v13 }
 0x1f0   : > { %2041 = vst [vmem:[%s2580_s12 + $0x18] sm:$0xff] %v1902_v39   ;;  %v616_v17 = vmax.f32 %v522_v15, 0.0  ;;  %1139 = vmatmul.bf16.gmra.mxu2 %v981_v14 }
 0x1f1   : > { %v812_v18 = vpop.f32.mrf.mxu1 }
 0x1f2   : > { %v657_v19 = vpack.c.bf16 %v616_v17, %v615_v16  ;;  %v813_v22 = vadd.f32 %v2485_v9, %v812_v18  ;;  %v549_v16 = vpop.f32.mrf.mxu3 }
 0x1f3   : > { %v1100_v20 = vpop.f32.mrf.mxu2 }
 0x1f4   : > { %851 = vmatmul.bf16.gmra.mxu1 %v657_v19  ;;  %v932_v24 = vmax.f32 %v813_v22, 0.0  ;;  %v1101_v26 = vadd.f32 %v2572_v4, %v1100_v20 }
 0x1f5   : > { %v524_v21 = vpop.f32.mrf.mxu0 }
 0x1f6   : > { %v525_v49 = vadd.f32 %v2387_v38, %v524_v21 }
 0x1f8   : > { %v617_v53 = vmax.f32 %v525_v49, 0.0 }
 0x1f9   : > { %v814_v43 = vpop.f32.mrf.mxu1 }
 0x1fa   : > { %v815_v23 = vadd.f32 %v2485_v9, %v814_v43 }
 0x1fb   : > { %v1102_v25 = vpop.f32.mrf.mxu2 }
 0x1fc   : > { %v933_v27 = vmax.f32 %v815_v23, 0.0  ;;  %v1103_v29 = vadd.f32 %v2572_v4, %v1102_v25  ;;  %v551_v23 = vpop.f32.mrf.mxu3  ;;  %v542_v25 = vadd.f32 %v2387_v38, %v541_v44  ;;  %v2644_v44 = vld [vmem:[%s2905_s2] ss:$0 sm:$0xff] }
 0x1fd   : > { %v526_v52 = vpop.f32.mrf.mxu0 }
 0x1fe   : > { %v982_v31 = vpack.c.bf16 %v933_v27, %v932_v24  ;;  %v1907_v32 = vpack.c.bf16 %v1103_v29, %v1101_v26  ;;  %v527_v33 = vadd.f32 %v2387_v38, %v526_v52  ;;  %v540_v24 = vadd.f32 %v2387_v38, %v2614_v30 }
 0x200   : > { %2042 = vst [vmem:[%s2580_s12 + $0x20] sm:$0xff] %v1907_v32   ;;  %v618_v35 = vmax.f32 %v527_v33, 0.0  ;;  %1144 = vmatmul.bf16.gmra.mxu2 %v982_v31  ;;  %v623_v32 = vmax.f32 %v540_v24, 0.0  ;;  %v624_v33 = vmax.f32 %v542_v25, 0.0 }
 0x201   : > { %v817_v36 = vpop.f32.mrf.mxu1 }
 0x202   : > { %v658_v40 = vpack.c.bf16 %v618_v35, %v617_v53  ;;  %v818_v45 = vadd.f32 %v2485_v9, %v817_v36 }
 0x203   : > { %v1105_v41 = vpop.f32.mrf.mxu2 }
 0x204   : > { %856 = vmatmul.bf16.gmra.mxu1 %v658_v40  ;;  %v934_v48 = vmax.f32 %v818_v45, 0.0  ;;  %v1106_v51 = vadd.f32 %v2572_v4, %v1105_v41  ;;  %v661_v40 = vpack.c.bf16 %v624_v33, %v623_v32  ;;  %v554_v41 = vpop.f32.mrf.mxu3  ;;  %v545_v45 = vadd.f32 %v2644_v44, %v544_v58 }
 0x205   : > { %v529_v42 = vpop.f32.mrf.mxu0 }
 0x206   : > { %v530_v54 = vadd.f32 %v2387_v38, %v529_v42 }
 0x208   : > { %v619_v62 = vmax.f32 %v530_v54, 0.0 }
 0x209   : > { %v819_v46 = vpop.f32.mrf.mxu1 }
 0x20a   : > { %v820_v47 = vadd.f32 %v2485_v9, %v819_v46  ;;  %v547_v46 = vadd.f32 %v2644_v44, %v546_v5  ;;  %v552_v5 = vadd.f32 %v2644_v44, %v551_v23 }
 0x20b   : > { %v1107_v50 = vpop.f32.mrf.mxu2 }
 0x20c   : > { %v935_v55 = vmax.f32 %v820_v47, 0.0  ;;  %v1108_v56 = vadd.f32 %v2572_v4, %v1107_v50 }
 0x20d   : > { %v531_v57 = vpop.f32.mrf.mxu0 }
 0x20e   : > { %v983_v59 = vpack.c.bf16 %v935_v55, %v934_v48  ;;  %v1912_v60 = vpack.c.bf16 %v1108_v56, %v1106_v51  ;;  %v532_v61 = vadd.f32 %v2387_v38, %v531_v57  ;;  %v556_v56 = vpop.f32.mrf.mxu3  ;;  %v625_v57 = vmax.f32 %v545_v45, 0.0 }
 0x210   : > { %2043 = vst [vmem:[%s2580_s12 + $0x28] sm:$0xff] %v1912_v60   ;;  %v620_v63 = vmax.f32 %v532_v61, 0.0  ;;  %1149 = vmatmul.bf16.gmra.mxu2 %v983_v59  ;;  %v626_v59 = vmax.f32 %v547_v46, 0.0 }
 0x211   : > { %v822_v0 = vpop.f32.mrf.mxu1 }
 0x212   : > { %v659_v1 = vpack.c.bf16 %v620_v63, %v619_v62  ;;  %v823_v28 = vadd.f32 %v2485_v9, %v822_v0  ;;  %v662_v58 = vpack.c.bf16 %v626_v59, %v625_v57 }
 0x213   : > { %v1110_v2 = vpop.f32.mrf.mxu2 }
 0x214   : > { %861 = vmatmul.bf16.gmra.mxu1 %v659_v1  ;;  %v936_v8 = vmax.f32 %v823_v28, 0.0  ;;  %v1111_v34 = vadd.f32 %v2572_v4, %v1110_v2 }
 0x215   : > { %v534_v3 = vpop.f32.mrf.mxu0 }
 0x216   : > { %v535_v11 = vadd.f32 %v2387_v38, %v534_v3  ;;  %v559_v0 = vpop.f32.mrf.mxu3  ;;  %v550_v3 = vadd.f32 %v2644_v44, %v549_v16 }
 0x218   : > { %v621_v17 = vmax.f32 %v535_v11, 0.0  ;;  %v627_v11 = vmax.f32 %v550_v3, 0.0 }
 0x219   : > { %v824_v6 = vpop.f32.mrf.mxu1 }
 0x21a   : > { %v825_v7 = vadd.f32 %v2485_v9, %v824_v6 }
 0x21b   : > { %v1112_v10 = vpop.f32.mrf.mxu2 }
 0x21c   : > { %v937_v12 = vmax.f32 %v825_v7, 0.0  ;;  %v1113_v37 = vadd.f32 %v2572_v4, %v1112_v10 }
 0x21d   : > { %v536_v13 = vpop.f32.mrf.mxu0 }
 0x21e   : > { %v984_v14 = vpack.c.bf16 %v937_v12, %v936_v8  ;;  %v1917_v39 = vpack.c.bf16 %v1113_v37, %v1111_v34  ;;  %v537_v15 = vadd.f32 %v2387_v38, %v536_v13  ;;  %v628_v12 = vmax.f32 %v552_v5, 0.0 }
 0x220   : > { %2044 = vst [vmem:[%s2580_s12 + $0x30] sm:$0xff] %v1917_v39   ;;  %v622_v18 = vmax.f32 %v537_v15, 0.0  ;;  %1154 = vmatmul.bf16.gmra.mxu2 %v984_v14  ;;  %v561_v39 = vpop.f32.mrf.mxu3  ;;  %v663_v15 = vpack.c.bf16 %v628_v12, %v627_v11 }
 0x221   : > { %v827_v19 = vpop.f32.mrf.mxu1 }
 0x222   : > { %v660_v20 = vpack.c.bf16 %v622_v18, %v621_v17  ;;  %v828_v22 = vadd.f32 %v2485_v9, %v827_v19  ;;  %v555_v19 = vadd.f32 %v2644_v44, %v554_v41 }
 0x223   : > { %v1115_v21 = vpop.f32.mrf.mxu2 }
 0x224   : > { %866 = vmatmul.bf16.vlgmr.msrb.gmra.mxu3 %v660_v20  ;;  %v938_v27 = vmax.f32 %v828_v22, 0.0  ;;  %v1116_v29 = vadd.f32 %v2572_v4, %v1115_v21  ;;  %v557_v20 = vadd.f32 %v2644_v44, %v556_v56 }
 0x229   : > { %v829_v43 = vpop.f32.mrf.mxu1 }
 0x22a   : > { %v830_v26 = vadd.f32 %v2485_v9, %v829_v43  ;;  %v564_v43 = vpop.f32.mrf.mxu3 }
 0x22b   : > { %v1117_v49 = vpop.f32.mrf.mxu2 }
 0x22c   : > { %v939_v52 = vmax.f32 %v830_v26, 0.0  ;;  %v1118_v31 = vadd.f32 %v2572_v4, %v1117_v49  ;;  %v629_v49 = vmax.f32 %v555_v19, 0.0 }
 0x22e   : > { %v985_v53 = vpack.c.bf16 %v939_v52, %v938_v27  ;;  %v1922_v35 = vpack.c.bf16 %v1118_v31, %v1116_v29  ;;  %v630_v27 = vmax.f32 %v557_v20, 0.0 }
 0x230   : > { %2045 = vst [vmem:[%s2580_s12 + $0x38] sm:$0xff] %v1922_v35   ;;  %1159 = vmatmul.bf16.gmra.mxu2 %v985_v53  ;;  %v664_v32 = vpack.c.bf16 %v630_v27, %v629_v49 }
 0x231   : > { %v832_v36 = vpop.f32.mrf.mxu1 }
 0x232   : > { %v833_v38 = vadd.f32 %v2485_v9, %v832_v36  ;;  %v566_v53 = vpop.f32.mrf.mxu3 }
 0x233   : > { %v1120_v30 = vpop.f32.mrf.mxu2 }
 0x234   : > { %871 = vmatmul.bf16.gmra.mxu3 %v661_v40  ;;  %v940_v50 = vmax.f32 %v833_v38, 0.0  ;;  %v1121_v51 = vadd.f32 %v2572_v4, %v1120_v30  ;;  %v560_v40 = vadd.f32 %v2644_v44, %v559_v0  ;;  %v562_v30 = vadd.f32 %v2644_v44, %v561_v39 }
 0x239   : > { %v834_v42 = vpop.f32.mrf.mxu1 }
 0x23a   : > { %v835_v47 = vadd.f32 %v2485_v9, %v834_v42 }
 0x23b   : > { %v1122_v48 = vpop.f32.mrf.mxu2 }
 0x23c   : > { %v941_v54 = vmax.f32 %v835_v47, 0.0  ;;  %v1123_v55 = vadd.f32 %v2572_v4, %v1122_v48 }
 0x23e   : > { %v986_v60 = vpack.c.bf16 %v941_v54, %v940_v50  ;;  %v1927_v61 = vpack.c.bf16 %v1123_v55, %v1121_v51  ;;  %v631_v50 = vmax.f32 %v560_v40, 0.0  ;;  %v632_v51 = vmax.f32 %v562_v30, 0.0 }
 0x23f   : > { %v569_v48 = vpop.f32.mrf.mxu3 }
 0x240   : > { %2046 = vst [vmem:[%s2580_s12 + $0x40] sm:$0xff] %v1927_v61   ;;  %1164 = vmatmul.bf16.gmra.mxu2 %v986_v60  ;;  %v665_v57 = vpack.c.bf16 %v632_v51, %v631_v50 }
 0x241   : > { %v837_v62 = vpop.f32.mrf.mxu1 }
 0x242   : > { %v838_v1 = vadd.f32 %v2485_v9, %v837_v62 }
 0x243   : > { %v1125_v63 = vpop.f32.mrf.mxu2 }
 0x244   : > { %876 = vmatmul.bf16.gmra.mxu3 %v662_v58  ;;  %v942_v7 = vmax.f32 %v838_v1, 0.0  ;;  %v1126_v8 = vadd.f32 %v2572_v4, %v1125_v63  ;;  %v565_v58 = vadd.f32 %v2644_v44, %v564_v43  ;;  %v567_v63 = vadd.f32 %v2644_v44, %v566_v53 }
 0x247   : > { %v571_v60 = vpop.f32.mrf.mxu3 }
 0x249   : > { %v839_v2 = vpop.f32.mrf.mxu1 }
 0x24a   : > { %v840_v28 = vadd.f32 %v2485_v9, %v839_v2 }
 0x24b   : > { %v1127_v6 = vpop.f32.mrf.mxu2 }
 0x24c   : > { %v943_v10 = vmax.f32 %v840_v28, 0.0  ;;  %v1128_v34 = vadd.f32 %v2572_v4, %v1127_v6  ;;  %v633_v6 = vmax.f32 %v565_v58, 0.0 }
 0x24e   : > { %v987_v37 = vpack.c.bf16 %v943_v10, %v942_v7  ;;  %v1932_v13 = vpack.c.bf16 %v1128_v34, %v1126_v8  ;;  %v634_v7 = vmax.f32 %v567_v63, 0.0 }
 0x250   : > { %2047 = vst [vmem:[%s2580_s12 + $0x48] sm:$0xff] %v1932_v13   ;;  %1169 = vmatmul.bf16.gmra.mxu2 %v987_v37  ;;  %v666_v11 = vpack.c.bf16 %v634_v7, %v633_v6  ;;  %v570_v37 = vadd.f32 %v2644_v44, %v569_v48 }
 0x251   : > { %v842_v14 = vpop.f32.mrf.mxu1 }
 0x252   : > { %v843_v17 = vadd.f32 %v2485_v9, %v842_v14 }
 0x253   : > { %v1130_v16 = vpop.f32.mrf.mxu2 }
 0x254   : > { %881 = vmatmul.bf16.gmra.mxu3 %v663_v15  ;;  %v944_v23 = vmax.f32 %v843_v17, 0.0  ;;  %v1131_v24 = vadd.f32 %v2572_v4, %v1130_v16  ;;  %v635_v16 = vmax.f32 %v570_v37, 0.0 }
 0x256   : > { %v667_v43 = vpack.c.bf16 %v635_v16, %v635_v16 }
 0x259   : > { %v844_v18 = vpop.f32.mrf.mxu1 }
 0x25a   : > { %v845_v21 = vadd.f32 %v2485_v9, %v844_v18 }
 0x25b   : > { %v1132_v22 = vpop.f32.mrf.mxu2 }
 0x25c   : > { %v945_v25 = vmax.f32 %v845_v21, 0.0  ;;  %v1133_v26 = vadd.f32 %v2572_v4, %v1132_v22 }
 0x25e   : > { %v988_v29 = vpack.c.bf16 %v945_v25, %v944_v23  ;;  %v1937_v52 = vpack.c.bf16 %v1133_v26, %v1131_v24 }
 0x260   : > { %2048 = vst [vmem:[%s2580_s12 + $0x50] sm:$0xff] %v1937_v52   ;;  %1174 = vmatmul.bf16.gmra.mxu2 %v988_v29 }
 0x261   : > { %v847_v31 = vpop.f32.mrf.mxu1 }
 0x262   : > { %v848_v35 = vadd.f32 %v2485_v9, %v847_v31 }
 0x263   : > { %v1135_v33 = vpop.f32.mrf.mxu2 }
 0x264   : > { %886 = vmatmul.bf16.gmra.mxu3 %v664_v32  ;;  %v946_v42 = vmax.f32 %v848_v35, 0.0  ;;  %v1136_v45 = vadd.f32 %v2572_v4, %v1135_v33 }
 0x269   : > { %v849_v36 = vpop.f32.mrf.mxu1 }
 0x26a   : > { %v850_v41 = vadd.f32 %v2485_v9, %v849_v36 }
 0x26b   : > { %v1137_v38 = vpop.f32.mrf.mxu2 }
 0x26c   : > { %v947_v46 = vmax.f32 %v850_v41, 0.0  ;;  %v1138_v47 = vadd.f32 %v2572_v4, %v1137_v38 }
 0x26e   : > { %v989_v54 = vpack.c.bf16 %v947_v46, %v946_v42  ;;  %v1942_v55 = vpack.c.bf16 %v1138_v47, %v1136_v45 }
 0x270   : > { %2049 = vst [vmem:[%s2580_s12 + $0x58] sm:$0xff] %v1942_v55   ;;  %1179 = vmatmul.bf16.gmra.mxu2 %v989_v54 }
 0x271   : > { %v852_v56 = vpop.f32.mrf.mxu1 }
 0x272   : > { %v853_v61 = vadd.f32 %v2485_v9, %v852_v56 }
 0x273   : > { %v1140_v59 = vpop.f32.mrf.mxu2 }
 0x274   : > { %891 = vmatmul.bf16.gmra.mxu3 %v665_v57  ;;  %v948_v2 = vmax.f32 %v853_v61, 0.0  ;;  %v1141_v3 = vadd.f32 %v2572_v4, %v1140_v59 }
 0x279   : > { %v854_v62 = vpop.f32.mrf.mxu1 }
 0x27a   : > { %v855_v0 = vadd.f32 %v2485_v9, %v854_v62 }
 0x27b   : > { %v1142_v1 = vpop.f32.mrf.mxu2 }
 0x27c   : > { %v949_v5 = vmax.f32 %v855_v0, 0.0  ;;  %v1143_v28 = vadd.f32 %v2572_v4, %v1142_v1 }
 0x27e   : > { %v990_v8 = vpack.c.bf16 %v949_v5, %v948_v2  ;;  %v1947_v10 = vpack.c.bf16 %v1143_v28, %v1141_v3 }
 0x280   : > { %2050 = vst [vmem:[%s2580_s12 + $0x60] sm:$0xff] %v1947_v10   ;;  %1184 = vmatmul.bf16.gmra.mxu2 %v990_v8 }
 0x281   : > { %v857_v34 = vpop.f32.mrf.mxu1 }
 0x282   : > { %v858_v13 = vadd.f32 %v2485_v9, %v857_v34 }
 0x283   : > { %v1145_v12 = vpop.f32.mrf.mxu2 }
 0x284   : > { %896 = vmatmul.bf16.gmra.mxu3 %v666_v11  ;;  %v950_v17 = vmax.f32 %v858_v13, 0.0  ;;  %v1146_v18 = vadd.f32 %v2572_v4, %v1145_v12 }
 0x289   : > { %v859_v14 = vpop.f32.mrf.mxu1 }
 0x28a   : > { %v860_v39 = vadd.f32 %v2485_v9, %v859_v14  ;;  %v2689_v9 = vld [vmem:[%s2905_s2 + $0x1] ss:$0 sm:$0xff] }
 0x28b   : > { %v1147_v15 = vpop.f32.mrf.mxu2 }
 0x28c   : > { %v951_v19 = vmax.f32 %v860_v39, 0.0  ;;  %v1148_v20 = vadd.f32 %v2572_v4, %v1147_v15 }
 0x28e   : > { %v991_v21 = vpack.c.bf16 %v951_v19, %v950_v17  ;;  %v1952_v22 = vpack.c.bf16 %v1148_v20, %v1146_v18 }
 0x290   : > { %2051 = vst [vmem:[%s2580_s12 + $0x68] sm:$0xff] %v1952_v22   ;;  %1189 = vmatmul.bf16.gmra.mxu2 %v991_v21 }
 0x291   : > { %v862_v44 = vpop.f32.mrf.mxu1 }
 0x292   : > { %v863_v24 = vadd.f32 %v2689_v9, %v862_v44 }
 0x293   : > { %v1150_v23 = vpop.f32.mrf.mxu2 }
 0x294   : > { %901 = vmatmul.bf16.gmra.mxu3 %v667_v43  ;;  %v952_v27 = vmax.f32 %v863_v24, 0.0  ;;  %v1151_v29 = vadd.f32 %v2572_v4, %v1150_v23 }
 0x299   : > { %v864_v25 = vpop.f32.mrf.mxu1 }
 0x29a   : > { %v865_v26 = vadd.f32 %v2689_v9, %v864_v25 }
 0x29b   : > { %v1152_v49 = vpop.f32.mrf.mxu2 }
 0x29c   : > { %v953_v52 = vmax.f32 %v865_v26, 0.0  ;;  %v1153_v31 = vadd.f32 %v2572_v4, %v1152_v49 }
 0x29e   : > { %v992_v32 = vpack.c.bf16 %v953_v52, %v952_v27  ;;  %v1957_v33 = vpack.c.bf16 %v1153_v31, %v1151_v29 }
 0x2a0   : > { %2052 = vst [vmem:[%s2580_s12 + $0x70] sm:$0xff] %v1957_v33   ;;  %1194 = vmatmul.bf16.gmra.mxu2 %v992_v32 }
 0x2a3   : > { %v1155_v53 = vpop.f32.mrf.mxu2 }
 0x2a4   : > { %v1156_v40 = vadd.f32 %v2572_v4, %v1155_v53 }
 0x2a7   : > { %v867_v35 = vpop.f32.mrf.mxu3 }
 0x2a8   : > { %v868_v41 = vadd.f32 %v2689_v9, %v867_v35 }
 0x2aa   : > { %v954_v46 = vmax.f32 %v868_v41, 0.0 }
 0x2ab   : > { %v1157_v36 = vpop.f32.mrf.mxu2 }
 0x2ac   : > { %v1158_v30 = vadd.f32 %v2572_v4, %v1157_v36 }
 0x2ae   : > { %v1962_v38 = vpack.c.bf16 %v1158_v30, %v1156_v40 }
 0x2af   : > { %v869_v42 = vpop.f32.mrf.mxu3 }
 0x2b0   : > { %2053 = vst [vmem:[%s2580_s12 + $0x78] sm:$0xff] %v1962_v38   ;;  %v870_v45 = vadd.f32 %v2689_v9, %v869_v42 }
 0x2b2   : > { %v955_v47 = vmax.f32 %v870_v45, 0.0 }
 0x2b3   : > { %v1160_v48 = vpop.f32.mrf.mxu2 }
 0x2b4   : > { %v993_v50 = vpack.c.bf16 %v955_v47, %v954_v46  ;;  %v1161_v55 = vadd.f32 %v2572_v4, %v1160_v48 }
 0x2b6   : > { %1199 = vmatmul.bf16.vlgmr.msra.gmra.mxu3 %v993_v50 }
 0x2b7   : > { %v872_v51 = vpop.f32.mrf.mxu3 }
 0x2b8   : > { %v873_v57 = vadd.f32 %v2689_v9, %v872_v51 }
 0x2ba   : > { %v956_v62 = vmax.f32 %v873_v57, 0.0 }
 0x2bb   : > { %v1162_v54 = vpop.f32.mrf.mxu2 }
 0x2bc   : > { %v1163_v56 = vadd.f32 %v2572_v4, %v1162_v54 }
 0x2be   : > { %v1967_v59 = vpack.c.bf16 %v1163_v56, %v1161_v55 }
 0x2bf   : > { %v874_v60 = vpop.f32.mrf.mxu3 }
 0x2c0   : > { %2054 = vst [vmem:[%s2580_s12 + $0x80] sm:$0xff] %v1967_v59   ;;  %v875_v61 = vadd.f32 %v2689_v9, %v874_v60 }
 0x2c2   : > { %v957_v58 = vmax.f32 %v875_v61, 0.0 }
 0x2c3   : > { %v1165_v63 = vpop.f32.mrf.mxu2 }
 0x2c4   : > { %v994_v0 = vpack.c.bf16 %v957_v58, %v956_v62  ;;  %v1166_v3 = vadd.f32 %v2572_v4, %v1165_v63 }
 0x2c6   : > { %1204 = vmatmul.bf16.gmra.mxu3 %v994_v0 }
 0x2c7   : > { %v877_v1 = vpop.f32.mrf.mxu3 }
 0x2c8   : > { %v878_v28 = vadd.f32 %v2689_v9, %v877_v1 }
 0x2ca   : > { %v958_v10 = vmax.f32 %v878_v28, 0.0 }
 0x2cb   : > { %v1167_v2 = vpop.f32.mrf.mxu2 }
 0x2cc   : > { %v1168_v5 = vadd.f32 %v2572_v4, %v1167_v2 }
 0x2ce   : > { %v1972_v6 = vpack.c.bf16 %v1168_v5, %v1166_v3 }
 0x2cf   : > { %v879_v7 = vpop.f32.mrf.mxu3 }
 0x2d0   : > { %2055 = vst [vmem:[%s2580_s12 + $0x88] sm:$0xff] %v1972_v6   ;;  %v880_v8 = vadd.f32 %v2689_v9, %v879_v7 }
 0x2d2   : > { %v959_v34 = vmax.f32 %v880_v8, 0.0 }
 0x2d3   : > { %v1170_v11 = vpop.f32.mrf.mxu2 }
 0x2d4   : > { %v995_v12 = vpack.c.bf16 %v959_v34, %v958_v10  ;;  %v1171_v14 = vadd.f32 %v2572_v4, %v1170_v11 }
 0x2d6   : > { %1209 = vmatmul.bf16.gmra.mxu3 %v995_v12 }
 0x2d7   : > { %v882_v37 = vpop.f32.mrf.mxu3 }
 0x2d8   : > { %v883_v15 = vadd.f32 %v2689_v9, %v882_v37 }
 0x2da   : > { %v960_v19 = vmax.f32 %v883_v15, 0.0 }
 0x2db   : > { %v1172_v13 = vpop.f32.mrf.mxu2 }
 0x2dc   : > { %v1173_v39 = vadd.f32 %v2572_v4, %v1172_v13 }
 0x2de   : > { %v1977_v16 = vpack.c.bf16 %v1173_v39, %v1171_v14 }
 0x2df   : > { %v884_v17 = vpop.f32.mrf.mxu3 }
 0x2e0   : > { %2056 = vst [vmem:[%s2580_s12 + $0x90] sm:$0xff] %v1977_v16   ;;  %v885_v18 = vadd.f32 %v2689_v9, %v884_v17 }
 0x2e2   : > { %v961_v20 = vmax.f32 %v885_v18, 0.0 }
 0x2e3   : > { %v1175_v21 = vpop.f32.mrf.mxu2 }
 0x2e4   : > { %v996_v22 = vpack.c.bf16 %v961_v20, %v960_v19  ;;  %v1176_v23 = vadd.f32 %v2572_v4, %v1175_v21 }
 0x2e6   : > { %1214 = vmatmul.bf16.gmra.mxu3 %v996_v22 }
 0x2e7   : > { %v887_v43 = vpop.f32.mrf.mxu3 }
 0x2e8   : > { %v888_v25 = vadd.f32 %v2689_v9, %v887_v43 }
 0x2ea   : > { %v962_v29 = vmax.f32 %v888_v25, 0.0 }
 0x2eb   : > { %v1177_v44 = vpop.f32.mrf.mxu2 }
 0x2ec   : > { %v1178_v24 = vadd.f32 %v2572_v4, %v1177_v44 }
 0x2ee   : > { %v1982_v26 = vpack.c.bf16 %v1178_v24, %v1176_v23 }
 0x2ef   : > { %v889_v49 = vpop.f32.mrf.mxu3 }
 0x2f0   : > { %2057 = vst [vmem:[%s2580_s12 + $0x98] sm:$0xff] %v1982_v26   ;;  %v890_v27 = vadd.f32 %v2689_v9, %v889_v49 }
 0x2f2   : > { %v963_v52 = vmax.f32 %v890_v27, 0.0 }
 0x2f3   : > { %v1180_v31 = vpop.f32.mrf.mxu2 }
 0x2f4   : > { %v997_v32 = vpack.c.bf16 %v963_v52, %v962_v29  ;;  %v1181_v35 = vadd.f32 %v2572_v4, %v1180_v31 }
 0x2f6   : > { %1219 = vmatmul.bf16.gmra.mxu3 %v997_v32 }
 0x2f7   : > { %v892_v33 = vpop.f32.mrf.mxu3 }
 0x2f8   : > { %v893_v40 = vadd.f32 %v2689_v9, %v892_v33 }
 0x2fa   : > { %v964_v42 = vmax.f32 %v893_v40, 0.0 }
 0x2fb   : > { %v1182_v53 = vpop.f32.mrf.mxu2 }
 0x2fc   : > { %v1183_v36 = vadd.f32 %v2572_v4, %v1182_v53 }
 0x2fe   : > { %v1987_v30 = vpack.c.bf16 %v1183_v36, %v1181_v35 }
 0x2ff   : > { %v894_v41 = vpop.f32.mrf.mxu3 }
 0x300   : > { %2058 = vst [vmem:[%s2580_s12 + $0xa0] sm:$0xff] %v1987_v30   ;;  %v895_v38 = vadd.f32 %v2689_v9, %v894_v41 }
 0x302   : > { %v965_v45 = vmax.f32 %v895_v38, 0.0 }
 0x303   : > { %v1185_v46 = vpop.f32.mrf.mxu2 }
 0x304   : > { %v998_v47 = vpack.c.bf16 %v965_v45, %v964_v42  ;;  %v1186_v51 = vadd.f32 %v2572_v4, %v1185_v46 }
 0x306   : > { %1224 = vmatmul.bf16.gmra.mxu3 %v998_v47 }
 0x307   : > { %v897_v48 = vpop.f32.mrf.mxu3 }
 0x308   : > { %v898_v55 = vadd.f32 %v2689_v9, %v897_v48 }
 0x30a   : > { %v966_v60 = vmax.f32 %v898_v55, 0.0 }
 0x30b   : > { %v1187_v50 = vpop.f32.mrf.mxu2 }
 0x30c   : > { %v1188_v54 = vadd.f32 %v2572_v4, %v1187_v50 }
 0x30e   : > { %v1992_v56 = vpack.c.bf16 %v1188_v54, %v1186_v51 }
 0x30f   : > { %v899_v57 = vpop.f32.mrf.mxu3 }
 0x310   : > { %2059 = vst [vmem:[%s2580_s12 + $0xa8] sm:$0xff] %v1992_v56   ;;  %v900_v59 = vadd.f32 %v2689_v9, %v899_v57 }
 0x312   : > { %v967_v61 = vmax.f32 %v900_v59, 0.0 }
 0x313   : > { %v1190_v62 = vpop.f32.mrf.mxu2 }
 0x314   : > { %v999_v58 = vpack.c.bf16 %v967_v61, %v966_v60  ;;  %v1191_v2 = vadd.f32 %v2572_v4, %v1190_v62 }
 0x316   : > { %1229 = vmatmul.bf16.gmra.mxu3 %v999_v58 }
 0x317   : > { %v902_v63 = vpop.f32.mrf.mxu3 }
 0x318   : > { %v903_v0 = vadd.f32 %v2689_v9, %v902_v63 }
 0x31a   : > { %v968_v5 = vmax.f32 %v903_v0, 0.0 }
 0x31b   : > { %v1192_v1 = vpop.f32.mrf.mxu2 }
 0x31c   : > { %v1193_v3 = vadd.f32 %v2572_v4, %v1192_v1  ;;  %v1000_v7 = vpack.c.bf16 %v968_v5, %v968_v5 }
 0x31e   : > { %v1997_v28 = vpack.c.bf16 %v1193_v3, %v1191_v2 }
 0x31f   : > { %v904_v6 = vpop.f32.mrf.mxu3 }
 0x320   : > { %2060 = vst [vmem:[%s2580_s12 + $0xb0] sm:$0xff] %v1997_v28  }
 0x323   : > { %v1195_v8 = vpop.f32.mrf.mxu2 }
 0x324   : > { %v1196_v34 = vadd.f32 %v2572_v4, %v1195_v8 }
 0x326   : > { %1234 = vmatmul.bf16.gmra.mxu3 %v1000_v7 }
 0x32b   : > { %v1197_v10 = vpop.f32.mrf.mxu2 }
 0x32c   : > { %v1198_v11 = vadd.f32 %v2572_v4, %v1197_v10 }
 0x32e   : > { %v2002_v9 = vpack.c.bf16 %v1198_v11, %v1196_v34 }
 0x330   : > { %2061 = vst [vmem:[%s2580_s12 + $0xb8] sm:$0xff] %v2002_v9  }
 0x339   : > { %v1200_v12 = vpop.f32.mrf.mxu3 }
 0x33a   : > { %v1201_v13 = vadd.f32 %v2572_v4, %v1200_v12 }
 0x341   : > { %v1202_v37 = vpop.f32.mrf.mxu3 }
 0x342   : > { %v1203_v14 = vadd.f32 %v2572_v4, %v1202_v37 }
 0x344   : > { %v2007_v39 = vpack.c.bf16 %v1203_v14, %v1201_v13 }
 0x346   : > { %2062 = vst [vmem:[%s2580_s12 + $0xc0] sm:$0xff] %v2007_v39  }
 0x349   : > { %v1205_v15 = vpop.f32.mrf.mxu3 }
 0x34a   : > { %v1206_v17 = vadd.f32 %v2572_v4, %v1205_v15 }
 0x351   : > { %v1207_v16 = vpop.f32.mrf.mxu3 }
 0x352   : > { %v1208_v18 = vadd.f32 %v2572_v4, %v1207_v16 }
 0x354   : > { %v2012_v19 = vpack.c.bf16 %v1208_v18, %v1206_v17 }
 0x356   : > { %2063 = vst [vmem:[%s2580_s12 + $0xc8] sm:$0xff] %v2012_v19  }
 0x359   : > { %v1210_v20 = vpop.f32.mrf.mxu3 }
 0x35a   : > { %v1211_v22 = vadd.f32 %v2572_v4, %v1210_v20 }
 0x361   : > { %v1212_v21 = vpop.f32.mrf.mxu3 }
 0x362   : > { %v1213_v43 = vadd.f32 %v2572_v4, %v1212_v21 }
 0x364   : > { %v2017_v44 = vpack.c.bf16 %v1213_v43, %v1211_v22 }
 0x366   : > { %2064 = vst [vmem:[%s2580_s12 + $0xd0] sm:$0xff] %v2017_v44  }
 0x369   : > { %v1215_v23 = vpop.f32.mrf.mxu3 }
 0x36a   : > { %v1216_v25 = vadd.f32 %v2572_v4, %v1215_v23 }
 0x371   : > { %v1217_v24 = vpop.f32.mrf.mxu3 }
 0x372   : > { %v1218_v26 = vadd.f32 %v2572_v4, %v1217_v24 }
 0x374   : > { %v2022_v49 = vpack.c.bf16 %v1218_v26, %v1216_v25 }
 0x376   : > { %2065 = vst [vmem:[%s2580_s12 + $0xd8] sm:$0xff] %v2022_v49  }
 0x379   : > { %v1220_v27 = vpop.f32.mrf.mxu3 }
 0x37a   : > { %v1221_v52 = vadd.f32 %v2572_v4, %v1220_v27 }
 0x381   : > { %v1222_v29 = vpop.f32.mrf.mxu3 }
 0x382   : > { %v1223_v31 = vadd.f32 %v2572_v4, %v1222_v29 }
 0x384   : > { %v2027_v32 = vpack.c.bf16 %v1223_v31, %v1221_v52 }
 0x386   : > { %2066 = vst [vmem:[%s2580_s12 + $0xe0] sm:$0xff] %v2027_v32  }
 0x389   : > { %v1225_v33 = vpop.f32.mrf.mxu3 }
 0x38a   : > { %v1226_v35 = vadd.f32 %v2572_v4, %v1225_v33 }
 0x391   : > { %v1227_v53 = vpop.f32.mrf.mxu3 }
 0x392   : > { %v1228_v36 = vadd.f32 %v2572_v4, %v1227_v53 }
 0x394   : > { %v2032_v40 = vpack.c.bf16 %v1228_v36, %v1226_v35 }
 0x396   : > { %2067 = vst [vmem:[%s2580_s12 + $0xe8] sm:$0xff] %v2032_v40  }
 0x399   : > { %v1230_v30 = vpop.f32.mrf.mxu3 }
 0x39a   : > { %v1231_v38 = vadd.f32 %v2572_v4, %v1230_v30 }
 0x3a1   : > { %v1232_v41 = vpop.f32.mrf.mxu3 }
 0x3a2   : > { %v1233_v42 = vadd.f32 %v2572_v4, %v1232_v41 }
 0x3a4   : > { %v2037_v45 = vpack.c.bf16 %v1233_v42, %v1231_v38 }
 0x3a6   : > { %2068 = vst [vmem:[%s2580_s12 + $0xf0] sm:$0xff] %v2037_v45  }
 0x3a9   : > { %v1235_v46 = vpop.f32.mrf.mxu3 }
 0x3aa   : > { %v1236_v47 = vadd.f32 %v2572_v4, %v1235_v46 }
 0x3ac   : > { %v1301_v48 = vpack.c.bf16 %v1236_v47, %v1236_v47 }
 0x3ad   : > { %1371 = sbr.rel (!%p2314_p4) target bundleno = 1010 (0x3f2), region = 36 }
 0x3ae   : > { %1364 = vst [vmem:[%s2580_s12 + $0xf8] sm:$0xf] %v1301_v48 }
 0x3b1   : > { %v1237_v50 = vpop.f32.mrf.mxu3 }
 0x3b2   : > { %s2917_s9 = smov (!%p1374_p8, %s1373_s9), 63 }
 0x3b3   : > { %s1848_s18 = sshll.u32 %s2917_s9, 2 }
 0x3b4   : > { %p1851_p9 = scmp.eq.s32.totalorder %s1848_s18, 0 }
 0x3b5   : > { %s2774_s21 = sshrl.u32 (!%p1851_p9), %s2917_s9, 5 }
 0x3b6   : > { %1382 = sbr.rel (%p1851_p9) target bundleno = 1010 (0x3f2), region = 40  ;;  %p1852_p10 = scmp.le.s32.totalorder (!%p1851_p9), %s2774_s21, 0 }
 0x3bb   : > { %1661 = sbr.rel (%p1852_p10) target bundleno = 993 (0x3e1), region = 116  ;;  %s2908_s15 = smov (!%p1852_p10), %s2768_s17 }
 0x3bc   : > { %s2909_s20 = smov (!%p1852_p10), %s2580_s12  ;;  %s2783_s23 = smov (!%p1852_p10), 0  }
 0x3bd   : > { %s2785_s22 = smov (!%p1852_p10), 0  }
 0x3c0 LB: >> { %v1399_v4 = vld [vmem:[%s2243_s20] sm:$0xf]  ;;  %v1401_v51 = vld [vmem:[%s2243_s20 + $0x4] sm:$0xf]  ;;  %v1403_v54 = vld [vmem:[%s2243_s20 + $0x8] sm:$0xf]  ;;  %s2251_s22 = sphi %s2785_s22, %s1393_s22   ;;  %s2247_s23 = sphi %s2783_s23, %s2912_s23   ;;  %s2243_s20 = sphi %s2909_s20, %s2911_s20   ;;  %s2239_s15 = sphi %s2908_s15, %s2910_s15  }
 0x3c1   : >> { %1400 = vst [vmem:[%s2239_s15] sm:$0xf] %v1399_v4  ;;  %v1405_v55 = vld [vmem:[%s2243_s20 + $0xc] sm:$0xf]  ;;  %v1407_v56 = vld [vmem:[%s2243_s20 + $0x10] sm:$0xf]  ;;  %s1463_s24 = sadd.s32 1, %s2247_s23 }
 0x3c2   : >> { %1402 = vst [vmem:[%s2239_s15 + $0x4] sm:$0xf] %v1401_v51  ;;  %v1409_v57 = vld [vmem:[%s2243_s20 + $0x14] sm:$0xf]  ;;  %v1411_v59 = vld [vmem:[%s2243_s20 + $0x18] sm:$0xf]  ;;  %p1464_p11 = scmp.ge.s32.totalorder %s1463_s24, %s2774_s21 }
 0x3c3   : >> { %1404 = vst [vmem:[%s2239_s15 + $0x8] sm:$0xf] %v1403_v54  ;;  %v1413_v60 = vld [vmem:[%s2243_s20 + $0x1c] sm:$0xf]  ;;  %v1415_v61 = vld [vmem:[%s2243_s20 + $0x20] sm:$0xf] }
 0x3c4   : >> { %1406 = vst [vmem:[%s2239_s15 + $0xc] sm:$0xf] %v1405_v55  ;;  %v1417_v62 = vld [vmem:[%s2243_s20 + $0x24] sm:$0xf]  ;;  %v1419_v58 = vld [vmem:[%s2243_s20 + $0x28] sm:$0xf] }
 0x3c5   : >> { %1408 = vst [vmem:[%s2239_s15 + $0x10] sm:$0xf] %v1407_v56  ;;  %v1421_v63 = vld [vmem:[%s2243_s20 + $0x2c] sm:$0xf]  ;;  %v1423_v0 = vld [vmem:[%s2243_s20 + $0x30] sm:$0xf] }
 0x3c6   : >> { %1410 = vst [vmem:[%s2239_s15 + $0x14] sm:$0xf] %v1409_v57  ;;  %v1425_v1 = vld [vmem:[%s2243_s20 + $0x34] sm:$0xf]  ;;  %v1427_v2 = vld [vmem:[%s2243_s20 + $0x38] sm:$0xf] }
 0x3c7   : >> { %1412 = vst [vmem:[%s2239_s15 + $0x18] sm:$0xf] %v1411_v59  ;;  %v1429_v3 = vld [vmem:[%s2243_s20 + $0x3c] sm:$0xf]  ;;  %v1431_v5 = vld [vmem:[%s2243_s20 + $0x40] sm:$0xf] }
 0x3c8   : >> { %1414 = vst [vmem:[%s2239_s15 + $0x1c] sm:$0xf] %v1413_v60  ;;  %v1433_v28 = vld [vmem:[%s2243_s20 + $0x44] sm:$0xf]  ;;  %s2919_s24 = smov (%p1464_p11, %s1463_s24), 0  ;;  %s1393_s22 = sadd.s32 1, %s2251_s22  }
 0x3c9   : >> { %1416 = vst [vmem:[%s2239_s15 + $0x20] sm:$0xf] %v1415_v61  ;;  %v1435_v6 = vld [vmem:[%s2243_s20 + $0x48] sm:$0xf]  ;;  %v1437_v7 = vld [vmem:[%s2243_s20 + $0x4c] sm:$0xf]  ;;  %p1392_p12 = scmp.ge.s32.totalorder %s1393_s22, %s2774_s21  ;;  %s2912_s23 = smov %s2919_s24 }
 0x3ca   : >> { %1418 = vst [vmem:[%s2239_s15 + $0x24] sm:$0xf] %v1417_v62  ;;  %s1853_s25 = sshll.u32 %s2919_s24, 7  ;;  %v1439_v8 = vld [vmem:[%s2243_s20 + $0x50] sm:$0xf] }
 0x3cb   : >> { %1420 = vst [vmem:[%s2239_s15 + $0x28] sm:$0xf] %v1419_v58  ;;  %s2844_s26 = scalar_lea.vmem %s2580_s12, %s1853_s25 [#allocation2]   ;;  %s1469_s27 = scalar_lea.vmem %s2768_s17, %s1853_s25   ;;  %v1441_v10 = vld [vmem:[%s2243_s20 + $0x54] sm:$0xf]  ;;  %v1443_v34 = vld [vmem:[%s2243_s20 + $0x58] sm:$0xf] }
 0x3cc   : >> { %1422 = vst [vmem:[%s2239_s15 + $0x2c] sm:$0xf] %v1421_v63  ;;  %v1445_v11 = vld [vmem:[%s2243_s20 + $0x5c] sm:$0xf]  ;;  %v1447_v9 = vld [vmem:[%s2243_s20 + $0x60] sm:$0xf] }
 0x3cd   : >> { %1424 = vst [vmem:[%s2239_s15 + $0x30] sm:$0xf] %v1423_v0  ;;  %v1449_v12 = vld [vmem:[%s2243_s20 + $0x64] sm:$0xf]  ;;  %v1451_v37 = vld [vmem:[%s2243_s20 + $0x68] sm:$0xf] }
 0x3ce   : >> { %1426 = vst [vmem:[%s2239_s15 + $0x34] sm:$0xf] %v1425_v1  ;;  %v1453_v13 = vld [vmem:[%s2243_s20 + $0x6c] sm:$0xf]  ;;  %v1455_v14 = vld [vmem:[%s2243_s20 + $0x70] sm:$0xf] }
 0x3cf   : >> { %1428 = vst [vmem:[%s2239_s15 + $0x38] sm:$0xf] %v1427_v2  ;;  %v1457_v39 = vld [vmem:[%s2243_s20 + $0x74] sm:$0xf]  ;;  %v1459_v15 = vld [vmem:[%s2243_s20 + $0x78] sm:$0xf] }
 0x3d0   : >> { %1430 = vst [vmem:[%s2239_s15 + $0x3c] sm:$0xf] %v1429_v3  ;;  %v1461_v16 = vld [vmem:[%s2243_s20 + $0x7c] sm:$0xf]  ;;  %s2911_s20 = smov %s2844_s26 }
 0x3d1   : >> { %1432 = vst [vmem:[%s2239_s15 + $0x40] sm:$0xf] %v1431_v5 }
 0x3d2   : >> { %1434 = vst [vmem:[%s2239_s15 + $0x44] sm:$0xf] %v1433_v28 }
 0x3d3   : >> { %1436 = vst [vmem:[%s2239_s15 + $0x48] sm:$0xf] %v1435_v6 }
 0x3d4   : >> { %1438 = vst [vmem:[%s2239_s15 + $0x4c] sm:$0xf] %v1437_v7 }
 0x3d5   : >> { %1440 = vst [vmem:[%s2239_s15 + $0x50] sm:$0xf] %v1439_v8 }
 0x3d6   : >> { %1442 = vst [vmem:[%s2239_s15 + $0x54] sm:$0xf] %v1441_v10 }
 0x3d7   : >> { %1444 = vst [vmem:[%s2239_s15 + $0x58] sm:$0xf] %v1443_v34 }
 0x3d8   : >> { %1446 = vst [vmem:[%s2239_s15 + $0x5c] sm:$0xf] %v1445_v11 }
 0x3d9   : >> { %1448 = vst [vmem:[%s2239_s15 + $0x60] sm:$0xf] %v1447_v9 }
 0x3da   : >> { %1450 = vst [vmem:[%s2239_s15 + $0x64] sm:$0xf] %v1449_v12 }
 0x3db   : >> { %1452 = vst [vmem:[%s2239_s15 + $0x68] sm:$0xf] %v1451_v37 }
 0x3dc   : >> { %1454 = vst [vmem:[%s2239_s15 + $0x6c] sm:$0xf] %v1453_v13  ;;  %1395 = sbr.rel (!%p1392_p12) target bundleno = 960 (0x3c0), region = 122 }
 0x3dd   : >> { %1456 = vst [vmem:[%s2239_s15 + $0x70] sm:$0xf] %v1455_v14 }
 0x3de   : >> { %1458 = vst [vmem:[%s2239_s15 + $0x74] sm:$0xf] %v1457_v39 }
 0x3df   : >> { %1460 = vst [vmem:[%s2239_s15 + $0x78] sm:$0xf] %v1459_v15 }
 0x3e0   : >> { %1462 = vst [vmem:[%s2239_s15 + $0x7c] sm:$0xf] %v1461_v16  ;;  %s2910_s15 = smov %s1469_s27 }
 0x3e1 PF: > { %s2885_s28 = sand.u32 31, %s2917_s9   ;;  %s1882_s29 = sshll.u32 %s2774_s21, 7 }
 0x3e2   : > { %s1474_s4 = scalar_lea.vmem %s2580_s12, %s1882_s29 [#allocation2]   ;;  %s1476_s5 = scalar_lea.vmem %s2768_s17, %s1882_s29  }
 0x3e3   : > { %p1858_p13 = scmp.le.s32.totalorder %s2885_s28, 0 }
 0x3e4   : > { %s2253_s30 = smov (!%p1858_p13), %s1476_s5   ;;  %s2257_s6 = smov (!%p1858_p13), %s1474_s4  }
 0x3e5   : > { %1675 = sbr.rel (%p1858_p13) target bundleno = 1010 (0x3f2), region = 127  ;;  %s2261_s7 = smov (!%p1858_p13), 0  }
 0x3e6   : > { %s2265_s8 = smov (!%p1858_p13), 0  }
 0x3ea LB: >> { %v1486_v17 = vld [vmem:[%s2259_s6] sm:$0xf]  ;;  %s1488_s9 = sadd.s32 1, %s2263_s7  ;;  %s1480_s8 = sadd.s32 1, %s2267_s8   ;;  %s2267_s8 = sphi %s2265_s8, %s1480_s8   ;;  %s2263_s7 = sphi %s2261_s7, %s2262_s7   ;;  %s2259_s6 = sphi %s2257_s6, %s1493_s6   ;;  %s2255_s30 = sphi %s2253_s30, %s1494_s30  }
 0x3eb   : >> { %1487 = vst [vmem:[%s2255_s30] sm:$0xf] %v1486_v17  ;;  %p1489_p0 = scmp.ge.s32.totalorder %s1488_s9, %s2885_s28  ;;  %p1479_p1 = scmp.ge.s32.totalorder %s1480_s8, %s2885_s28 }
 0x3ed   : >> { %s2921_s9 = smov (%p1489_p0, %s1488_s9), 0  ;;  %1482 = sbr.rel (!%p1479_p1) target bundleno = 1002 (0x3ea), region = 133 }
 0x3ee   : >> { %s1859_s12 = sshll.u32 %s2921_s9, 2  ;;  %s2262_s7 = smov %s2921_s9  }
 0x3ef   : >> { %s1493_s6 = scalar_lea.vmem %s1474_s4, %s1859_s12 [#allocation2]   ;;  %s1494_s30 = scalar_lea.vmem %s1476_s5, %s1859_s12  }
 0x3f2 PF: > { %p10_p2 = scmp.ge.s32.totalorder %s2304_s16, 4   ;;  %s2913_s12 = smov %s2231_s13 }
 0x3f3   : > { %s2914_s13 = smov %s2312_s19  ;;  %s2915_s14 = smov %s2304_s16 }
 0x3f4   :  { %12 = sbr.rel (!%p10_p2) target bundleno = 2 (0x2), region = 144 }

</bundles_post_ra>
